<compile_context>
chip_gen: v7x
topology: tpu7x:2x2x1
jax: 0.10.0
libtpu: 0.0.40
codegen_flags: <defaults>
</compile_context>

<pallas_src>
import functools

import jax
import jax.numpy as jnp
from jax.experimental import pallas as pl
from jax.experimental.pallas import tpu as pltpu

BN_EPS = 1e-5
LANE = 128
NEG_BIG = -1e30  # finite "-inf" for masking padded lanes (exp underflows to 0)


def _round_up(x, m):
    return ((x + m - 1) // m) * m


def _choose_tiles(n):
    """Row/K tile sizes for the adjacency.  K-tiling makes VMEM independent of
    N, so tiles only need to keep the MXU M-dim full (multiples of 256) and
    amortize the ~0.35us/step grid overhead.  Per-generation tuning (v5e/v6e:
    tm=512 + bigger VMEM budget; v7x: stay under 64 MiB/TC) can bump these;
    the defaults below fit every generation."""
    tm = 512 if n >= 2048 else 256
    if n >= 4096:
        tk = 1024
    elif n >= 1024:
        tk = 512
    else:
        tk = 256
    n_pad = _round_up(n, max(tm, tk))
    return tm, tk, n_pad


# --------------------------------------------------------------------------
# Kernel 1 (grid (i, k)):  acc += Â[i,k] @ T1[k]  ;  at last k:
#   H2[i] = relu(acc + b1') @ W2'
# (BN1 folded into T1 = X W1' and b1'; BN2 scale folded into W2'.)
# --------------------------------------------------------------------------
def _layer1_kernel(adj_ref, t1_ref, b1_ref, w2_ref, h2_ref, acc_ref):
    k = pl.program_id(1)

    @pl.when(k == 0)
    def _():
        acc_ref[...] = jnp.zeros_like(acc_ref)

    acc_ref[...] += jnp.dot(adj_ref[...], t1_ref[...],
                            preferred_element_type=jnp.float32)

    @pl.when(k == pl.num_programs(1) - 1)
    def _():
        h = jnp.maximum(acc_ref[...] + b1_ref[...], 0.0)
        # dropout: eval mode -> identity
        h2 = jnp.dot(h.astype(jnp.bfloat16), w2_ref[...],
                     preferred_element_type=jnp.float32)
        h2_ref[...] = h2.astype(h2_ref.dtype)


# --------------------------------------------------------------------------
# Kernel 2 (grid (i, k)):  acc += Â[i,k] @ H2[k]  ;  at last k:
#   out[i] = log_softmax(acc + b2')  over the feature axis
# --------------------------------------------------------------------------
def _layer2_kernel(adj_ref, h2_ref, b2_ref, out_ref, acc_ref, *, valid_cols):
    k = pl.program_id(1)

    @pl.when(k == 0)
    def _():
        acc_ref[...] = jnp.zeros_like(acc_ref)

    acc_ref[...] += jnp.dot(adj_ref[...], h2_ref[...],
                            preferred_element_type=jnp.float32)

    @pl.when(k == pl.num_programs(1) - 1)
    def _():
        y = acc_ref[...] + b2_ref[...]
        # mask padded feature lanes so they don't corrupt max / logsumexp
        col = jax.lax.broadcasted_iota(jnp.int32, y.shape, 1)
        y_m = jnp.where(col < valid_cols, y, NEG_BIG)
        m = jnp.max(y_m, axis=1, keepdims=True)
        z = y_m - m
        lse = jnp.log(jnp.sum(jnp.exp(z), axis=1, keepdims=True))
        out_ref[...] = z - lse


# --------------------------------------------------------------------------
# Per-graph (static) preprocessing: pad + cast the adjacency exactly once.
# --------------------------------------------------------------------------
def pad_adjacency(adj_norm, n_pad):
    n = adj_norm.shape[0]
    return jnp.pad(adj_norm.astype(jnp.bfloat16),
                   ((0, n_pad - n), (0, n_pad - n)))


# --------------------------------------------------------------------------
# Forward wrapper (adj_p already padded/cast once per graph)
# --------------------------------------------------------------------------
def gcn_layer_forward(x, adj_p, params, *, tm, tk):
    n, cin = x.shape
    n_pad = adj_p.shape[0]
    c1 = params["w1"].shape[1]
    c2 = params["w2"].shape[1]
    c1_pad = _round_up(c1, LANE)
    c2_pad = _round_up(c2, LANE)

    # ---- fold eval-mode BatchNorm into conv weights / biases ----
    s1 = params["bn1_g"] * jax.lax.rsqrt(params["bn1_v"] + BN_EPS)   # [1, c1]
    w1f = params["w1"] * s1
    b1f = (params["b1"] - params["bn1_m"]) * s1 + params["bn1_b"]
    s2 = params["bn2_g"] * jax.lax.rsqrt(params["bn2_v"] + BN_EPS)   # [1, c2]
    w2f = params["w2"] * s2
    b2f = (params["b2"] - params["bn2_m"]) * s2 + params["bn2_b"]

    # ---- transform-before-propagate: T1 = X W1' (tiny f32 matmul) ----
    t1 = jnp.dot(x, w1f, preferred_element_type=jnp.float32)
    t1_p = jnp.pad(t1, ((0, n_pad - n), (0, c1_pad - c1))).astype(jnp.bfloat16)

    b1_p = jnp.pad(b1f, ((0, 0), (0, c1_pad - c1)))                    # f32
    w2_p = jnp.pad(w2f, ((0, c1_pad - c1), (0, c2_pad - c2))).astype(jnp.bfloat16)
    b2_p = jnp.pad(b2f, ((0, 0), (0, c2_pad - c2)))                    # f32

    grid = (n_pad // tm, n_pad // tk)
    cparams = pltpu.CompilerParams(
        dimension_semantics=("parallel", "arbitrary"),
        vmem_limit_bytes=48 * 1024 * 1024,
    )
    adj_spec = pl.BlockSpec((tm, tk), lambda i, k: (i, k))

    # ---- phase 1: H2 = relu(Â T1 + b1') W2' ----
    cost1 = pl.CostEstimate(
        flops=2 * n_pad * n_pad * c1_pad + 2 * n_pad * c1_pad * c2_pad,
        transcendentals=0,
        bytes_accessed=adj_p.size * 2
        + (n_pad // tm) * t1_p.size * 2
        + w2_p.size * 2 + n_pad * c2_pad * 2,
    )
    h2 = pl.pallas_call(
        _layer1_kernel,
        out_shape=jax.ShapeDtypeStruct((n_pad, c2_pad), jnp.bfloat16),
        grid=grid,
        in_specs=[
            adj_spec,                                           # (tm, tk) @ (i, k)
            pl.BlockSpec((tk, c1_pad), lambda i, k: (k, 0)),    # T1 column tile
            pl.BlockSpec((1, c1_pad), lambda i, k: (0, 0)),     # b1'
            pl.BlockSpec((c1_pad, c2_pad), lambda i, k: (0, 0)),  # W2'
        ],
        out_specs=pl.BlockSpec((tm, c2_pad), lambda i, k: (i, 0)),
        scratch_shapes=[pltpu.VMEM((tm, c1_pad), jnp.float32)],
        compiler_params=cparams,
        cost_estimate=cost1,
    )(adj_p, t1_p, b1_p, w2_p)

    # ---- phase 2: out = log_softmax(Â H2 + b2') ----
    cost2 = pl.CostEstimate(
        flops=2 * n_pad * n_pad * c2_pad + 8 * n_pad * c2_pad,
        transcendentals=n_pad * c2_pad,
        bytes_accessed=adj_p.size * 2
        + (n_pad // tm) * h2.size * 2
        + n_pad * c2_pad * 4,
    )
    out_p = pl.pallas_call(
        functools.partial(_layer2_kernel, valid_cols=c2),
        out_shape=jax.ShapeDtypeStruct((n_pad, c2_pad), jnp.float32),
        grid=grid,
        in_specs=[
            adj_spec,
            pl.BlockSpec((tk, c2_pad), lambda i, k: (k, 0)),    # H2 column tile
            pl.BlockSpec((1, c2_pad), lambda i, k: (0, 0)),     # b2'
        ],
        out_specs=pl.BlockSpec((tm, c2_pad), lambda i, k: (i, 0)),
        scratch_shapes=[pltpu.VMEM((tm, c2_pad), jnp.float32)],
        compiler_params=cparams,
        cost_estimate=cost2,
    )(adj_p, h2, b2_p)

    return out_p[:n, :c2]


# --------------------------------------------------------------------------
# Glue: dense normalized adjacency + parameter init + f32 reference
# --------------------------------------------------------------------------
def build_normalized_adj(edge_index, num_nodes):
    """Dense  Â = D^-1/2 (A + I) D^-1/2  from edge_index [2, E] (src, dst)."""
    src, dst = edge_index[0], edge_index[1]
    a = jnp.zeros((num_nodes, num_nodes), jnp.float32)
    a = a.at[dst, src].add(1.0)                     # aggregate messages at target
    a = a + jnp.eye(num_nodes, dtype=jnp.float32)   # self loops
    deg = jnp.sum(a, axis=1)
    d_inv_sqrt = jnp.where(deg > 0, 1.0 / jnp.sqrt(deg), 0.0)
    return d_inv_sqrt[:, None] * a * d_inv_sqrt[None, :]


def init_params(key, in_channel, out_dim, out_channel):
    k1, k2, k3, k4, k5, k6, k7, k8 = jax.random.split(key, 8)

    def glorot(k, fan_in, fan_out):
        limit = jnp.sqrt(6.0 / (fan_in + fan_out))
        return jax.random.uniform(k, (fan_in, fan_out), jnp.float32, -limit, limit)

    # Non-trivial BN stats so the weight-folding path is actually exercised.
    return {
        "w1": glorot(k1, in_channel, out_dim),
        "b1": jnp.zeros((1, out_dim), jnp.float32),
        "w2": glorot(k2, out_dim, out_channel),
        "b2": jnp.zeros((1, out_channel), jnp.float32),
        "bn1_g": jax.random.uniform(k3, (1, out_dim), jnp.float32, 0.5, 1.5),
        "bn1_b": 0.1 * jax.random.normal(k4, (1, out_dim), jnp.float32),
        "bn1_m": 0.1 * jax.random.normal(k5, (1, out_dim), jnp.float32),
        "bn1_v": jax.random.uniform(k6, (1, out_dim), jnp.float32, 0.5, 1.5),
        "bn2_g": jax.random.uniform(k7, (1, out_channel), jnp.float32, 0.5, 1.5),
        "bn2_b": 0.1 * jax.random.normal(k8, (1, out_channel), jnp.float32),
        "bn2_m": jnp.zeros((1, out_channel), jnp.float32),
        "bn2_v": jnp.ones((1, out_channel), jnp.float32),
    }


def reference_forward(x, adj, p):
    """Plain-JAX f32 reference of the eval-mode forward."""
    def bn(h, g, b, m, v):
        return (h - m) * jax.lax.rsqrt(v + BN_EPS) * g + b

    h = adj @ (x @ p["w1"]) + p["b1"]
    h = jnp.maximum(bn(h, p["bn1_g"], p["bn1_b"], p["bn1_m"], p["bn1_v"]), 0.0)
    h = adj @ (h @ p["w2"]) + p["b2"]
    h = bn(h, p["bn2_g"], p["bn2_b"], p["bn2_m"], p["bn2_v"])
    return jax.nn.log_softmax(h, axis=1)


if __name__ == "__main__":
    num_nodes = 16
    in_channel = 8
    out_dim = 32
    out_channel = 16

    key = jax.random.PRNGKey(0)
    kx, ke, kp = jax.random.split(key, 3)

    # Node features [N, Cin]
    x = jax.random.normal(kx, (num_nodes, in_channel), jnp.float32)

    # Random edge_index [2, E] (directed edges)
    num_edges = 40
    edge_index = jax.random.randint(ke, (2, num_edges), 0, num_nodes, jnp.int32)

    adj_norm = build_normalized_adj(edge_index, num_nodes)
    params = init_params(kp, in_channel, out_dim, out_channel)

    # Static per-graph preprocessing: tile selection + one-time adjacency pad/cast.
    tm, tk, n_pad = _choose_tiles(num_nodes)
    adj_p = pad_adjacency(adj_norm, n_pad)

    fwd = jax.jit(functools.partial(gcn_layer_forward, tm=tm, tk=tk))
    out = fwd(x, adj_p, params)
    out = jax.block_until_ready(out)

    assert out.shape == (num_nodes, out_channel)
    assert bool(jnp.all(jnp.isfinite(out)))
    # rows of log_softmax should exp-sum to 1
    assert jnp.allclose(jnp.sum(jnp.exp(out), axis=1), 1.0, atol=1e-4)
    # match the f32 reference (loose tolerance: bf16 operands in the matmuls)
    ref = reference_forward(x, adj_norm, params)
    assert jnp.allclose(out, ref, atol=0.25), float(jnp.max(jnp.abs(out - ref)))
    print("KERNEL_OK")
</pallas_src>

<mosaic_0001>
module attributes {stable_mosaic.version = 11 : i64} {
  func.func @_layer1_kernel(%arg0: i32, %arg1: i32, %arg2: memref<256x256xbf16, #tpu.memory_space<vmem>>, %arg3: memref<256x128xbf16, #tpu.memory_space<vmem>>, %arg4: memref<1x128xf32, #tpu.memory_space<vmem>>, %arg5: memref<128x128xbf16, #tpu.memory_space<vmem>>, %arg6: memref<256x128xbf16, #tpu.memory_space<vmem>>, %arg7: memref<256x128xf32, #tpu.memory_space<vmem>>) attributes {dimension_semantics = [#tpu.dimension_semantics<parallel>, #tpu.dimension_semantics<arbitrary>], iteration_bounds = array<i64: 1, 1>, scalar_prefetch = 0 : i64, scratch_operands = 1 : i64, tpu.core_type = #tpu.core_type<tc>, window_params = [{transform_indices = @transform_0, window_bounds = array<i64: 256, 256>}, {transform_indices = @transform_1, window_bounds = array<i64: 256, 128>}, {pipeline_mode = #tpu.pipeline_mode<synchronous>, transform_indices = @transform_2, window_bounds = array<i64: 1, 128>}, {pipeline_mode = #tpu.pipeline_mode<synchronous>, transform_indices = @transform_3, window_bounds = array<i64: 128, 128>}, {transform_indices = @transform_4, window_bounds = array<i64: 256, 128>}]} {
    %c0_i32 = arith.constant 0 : i32
    %0 = arith.cmpi eq, %arg1, %c0_i32 : i32
    %1 = arith.extui %0 : i1 to i32
    %c0_i32_0 = arith.constant 0 : i32
    %2 = arith.cmpi ne, %1, %c0_i32_0 : i32
    scf.if %2 {
      %cst_10 = arith.constant 0.000000e+00 : f32
      %12 = vector.broadcast %cst_10 : f32 to vector<256x128xf32>
      %c0_11 = arith.constant 0 : index
      %c0_12 = arith.constant 0 : index
      %13 = vector.load %arg7[%c0_11, %c0_12] : memref<256x128xf32, #tpu.memory_space<vmem>>, vector<256x128xf32>
      tpu.vector_store %arg7[%c0_11, %c0_12], %12 {strides = array<i32>} : memref<256x128xf32, #tpu.memory_space<vmem>>, vector<256x128xf32>,
    } else {
    }
    %c0 = arith.constant 0 : index
    %c0_1 = arith.constant 0 : index
    %3 = vector.load %arg7[%c0, %c0_1] : memref<256x128xf32, #tpu.memory_space<vmem>>, vector<256x128xf32>
    %c0_2 = arith.constant 0 : index
    %c0_3 = arith.constant 0 : index
    %4 = vector.load %arg2[%c0_2, %c0_3] : memref<256x256xbf16, #tpu.memory_space<vmem>>, vector<256x256xbf16>
    %c0_4 = arith.constant 0 : index
    %c0_5 = arith.constant 0 : index
    %5 = vector.load %arg3[%c0_4, %c0_5] : memref<256x128xbf16, #tpu.memory_space<vmem>>, vector<256x128xbf16>
    %cst = arith.constant dense<0.000000e+00> : vector<256x128xf32>
    %6 = tpu.matmul %4, %5, %cst {dimension_numbers = #tpu.dot_dimension_numbers<[1], [0], [0], [1], [0, 0, 1, 1], [], []>} : vector<256x256xbf16>, vector<256x128xbf16>, vector<256x128xf32> -> vector<256x128xf32>
    %7 = arith.addf %3, %6 : vector<256x128xf32>
    %c0_6 = arith.constant 0 : index
    %c0_7 = arith.constant 0 : index
    %8 = vector.load %arg7[%c0_6, %c0_7] : memref<256x128xf32, #tpu.memory_space<vmem>>, vector<256x128xf32>
    tpu.vector_store %arg7[%c0_6, %c0_7], %7 {strides = array<i32>} : memref<256x128xf32, #tpu.memory_space<vmem>>, vector<256x128xf32>,
    %c0_i32_8 = arith.constant 0 : i32
    %9 = arith.cmpi eq, %arg1, %c0_i32_8 : i32
    %10 = arith.extui %9 : i1 to i32
    %c0_i32_9 = arith.constant 0 : i32
    %11 = arith.cmpi ne, %10, %c0_i32_9 : i32
    scf.if %11 {
      %c0_10 = arith.constant 0 : index
      %c0_11 = arith.constant 0 : index
      %12 = vector.load %arg7[%c0_10, %c0_11] : memref<256x128xf32, #tpu.memory_space<vmem>>, vector<256x128xf32>
      %c0_12 = arith.constant 0 : index
      %c0_13 = arith.constant 0 : index
      %13 = vector.load %arg4[%c0_12, %c0_13] : memref<1x128xf32, #tpu.memory_space<vmem>>, vector<1x128xf32>
      %14 = vector.broadcast %13 : vector<1x128xf32> to vector<256x128xf32>
      %15 = arith.addf %12, %14 : vector<256x128xf32>
      %cst_14 = arith.constant 0.000000e+00 : f32
      %16 = vector.broadcast %cst_14 : f32 to vector<256x128xf32>
      %17 = arith.maximumf %15, %16 : vector<256x128xf32>
      %18 = arith.truncf %17 : vector<256x128xf32> to vector<256x128xbf16>
      %c0_15 = arith.constant 0 : index
      %c0_16 = arith.constant 0 : index
      %19 = vector.load %arg5[%c0_15, %c0_16] : memref<128x128xbf16, #tpu.memory_space<vmem>>, vector<128x128xbf16>
      %cst_17 = arith.constant dense<0.000000e+00> : vector<256x128xf32>
      %20 = tpu.matmul %18, %19, %cst_17 {dimension_numbers = #tpu.dot_dimension_numbers<[1], [0], [0], [1], [0, 0, 1, 1], [], []>} : vector<256x128xbf16>, vector<128x128xbf16>, vector<256x128xf32> -> vector<256x128xf32>
      %21 = arith.truncf %20 : vector<256x128xf32> to vector<256x128xbf16>
      %c0_18 = arith.constant 0 : index
      %c0_19 = arith.constant 0 : index
      %22 = vector.load %arg6[%c0_18, %c0_19] : memref<256x128xbf16, #tpu.memory_space<vmem>>, vector<256x128xbf16>
      tpu.vector_store %arg6[%c0_18, %c0_19], %21 {strides = array<i32>} : memref<256x128xbf16, #tpu.memory_space<vmem>>, vector<256x128xbf16>,
    } else {
    }
    return
  }
  func.func @transform_0(%arg0: i32, %arg1: i32) -> (i32, i32) {
    %c0_i32 = arith.constant 0 : i32
    return %arg0, %arg1 : i32, i32
  }
  func.func @transform_1(%arg0: i32, %arg1: i32) -> (i32, i32) {
    %c0_i32 = arith.constant 0 : i32
    %c0_i32_0 = arith.constant 0 : i32
    return %arg1, %c0_i32 : i32, i32
  }
  func.func @transform_2(%arg0: i32, %arg1: i32) -> (i32, i32) {
    %c0_i32 = arith.constant 0 : i32
    %c0_i32_0 = arith.constant 0 : i32
    %c0_i32_1 = arith.constant 0 : i32
    return %c0_i32, %c0_i32_0 : i32, i32
  }
  func.func @transform_3(%arg0: i32, %arg1: i32) -> (i32, i32) {
    %c0_i32 = arith.constant 0 : i32
    %c0_i32_0 = arith.constant 0 : i32
    %c0_i32_1 = arith.constant 0 : i32
    return %c0_i32, %c0_i32_0 : i32, i32
  }
  func.func @transform_4(%arg0: i32, %arg1: i32) -> (i32, i32) {
    %c0_i32 = arith.constant 0 : i32
    %c0_i32_0 = arith.constant 0 : i32
    return %arg0, %c0_i32 : i32, i32
  }
}

module attributes {stable_mosaic.version = 11 : i64} {
  func.func @_layer2_kernel(%arg0: i32, %arg1: i32, %arg2: memref<256x256xbf16, #tpu.memory_space<vmem>>, %arg3: memref<256x128xbf16, #tpu.memory_space<vmem>>, %arg4: memref<1x128xf32, #tpu.memory_space<vmem>>, %arg5: memref<256x128xf32, #tpu.memory_space<vmem>>, %arg6: memref<256x128xf32, #tpu.memory_space<vmem>>) attributes {dimension_semantics = [#tpu.dimension_semantics<parallel>, #tpu.dimension_semantics<arbitrary>], iteration_bounds = array<i64: 1, 1>, scalar_prefetch = 0 : i64, scratch_operands = 1 : i64, tpu.core_type = #tpu.core_type<tc>, window_params = [{transform_indices = @transform_0, window_bounds = array<i64: 256, 256>}, {transform_indices = @transform_1, window_bounds = array<i64: 256, 128>}, {pipeline_mode = #tpu.pipeline_mode<synchronous>, transform_indices = @transform_2, window_bounds = array<i64: 1, 128>}, {transform_indices = @transform_3, window_bounds = array<i64: 256, 128>}]} {
    %c0_i32 = arith.constant 0 : i32
    %0 = arith.cmpi eq, %arg1, %c0_i32 : i32
    %1 = arith.extui %0 : i1 to i32
    %c0_i32_0 = arith.constant 0 : i32
    %2 = arith.cmpi ne, %1, %c0_i32_0 : i32
    scf.if %2 {
      %cst_10 = arith.constant 0.000000e+00 : f32
      %12 = vector.broadcast %cst_10 : f32 to vector<256x128xf32>
      %c0_11 = arith.constant 0 : index
      %c0_12 = arith.constant 0 : index
      %13 = vector.load %arg6[%c0_11, %c0_12] : memref<256x128xf32, #tpu.memory_space<vmem>>, vector<256x128xf32>
      tpu.vector_store %arg6[%c0_11, %c0_12], %12 {strides = array<i32>} : memref<256x128xf32, #tpu.memory_space<vmem>>, vector<256x128xf32>,
    } else {
    }
    %c0 = arith.constant 0 : index
    %c0_1 = arith.constant 0 : index
    %3 = vector.load %arg6[%c0, %c0_1] : memref<256x128xf32, #tpu.memory_space<vmem>>, vector<256x128xf32>
    %c0_2 = arith.constant 0 : index
    %c0_3 = arith.constant 0 : index
    %4 = vector.load %arg2[%c0_2, %c0_3] : memref<256x256xbf16, #tpu.memory_space<vmem>>, vector<256x256xbf16>
    %c0_4 = arith.constant 0 : index
    %c0_5 = arith.constant 0 : index
    %5 = vector.load %arg3[%c0_4, %c0_5] : memref<256x128xbf16, #tpu.memory_space<vmem>>, vector<256x128xbf16>
    %cst = arith.constant dense<0.000000e+00> : vector<256x128xf32>
    %6 = tpu.matmul %4, %5, %cst {dimension_numbers = #tpu.dot_dimension_numbers<[1], [0], [0], [1], [0, 0, 1, 1], [], []>} : vector<256x256xbf16>, vector<256x128xbf16>, vector<256x128xf32> -> vector<256x128xf32>
    %7 = arith.addf %3, %6 : vector<256x128xf32>
    %c0_6 = arith.constant 0 : index
    %c0_7 = arith.constant 0 : index
    %8 = vector.load %arg6[%c0_6, %c0_7] : memref<256x128xf32, #tpu.memory_space<vmem>>, vector<256x128xf32>
    tpu.vector_store %arg6[%c0_6, %c0_7], %7 {strides = array<i32>} : memref<256x128xf32, #tpu.memory_space<vmem>>, vector<256x128xf32>,
    %c0_i32_8 = arith.constant 0 : i32
    %9 = arith.cmpi eq, %arg1, %c0_i32_8 : i32
    %10 = arith.extui %9 : i1 to i32
    %c0_i32_9 = arith.constant 0 : i32
    %11 = arith.cmpi ne, %10, %c0_i32_9 : i32
    scf.if %11 {
      %c0_10 = arith.constant 0 : index
      %c0_11 = arith.constant 0 : index
      %12 = vector.load %arg6[%c0_10, %c0_11] : memref<256x128xf32, #tpu.memory_space<vmem>>, vector<256x128xf32>
      %c0_12 = arith.constant 0 : index
      %c0_13 = arith.constant 0 : index
      %13 = vector.load %arg4[%c0_12, %c0_13] : memref<1x128xf32, #tpu.memory_space<vmem>>, vector<1x128xf32>
      %14 = vector.broadcast %13 : vector<1x128xf32> to vector<256x128xf32>
      %15 = arith.addf %12, %14 : vector<256x128xf32>
      %16 = tpu.iota {dimensions = array<i32: 1>} : vector<256x128xi32>
      %c16_i32 = arith.constant 16 : i32
      %17 = vector.broadcast %c16_i32 : i32 to vector<256x128xi32>
      %18 = arith.cmpi slt, %16, %17 : vector<256x128xi32>
      %cst_14 = arith.constant -1.000000e+30 : f32
      %19 = vector.broadcast %cst_14 : f32 to vector<256x128xf32>
      %20 = arith.select %18, %15, %19 : vector<256x128xi1>, vector<256x128xf32>
      %cst_15 = arith.constant dense<0xFF800000> : vector<256xf32>
      %21 = vector.multi_reduction <maximumf>, %20, %cst_15 [1] : vector<256x128xf32> to vector<256xf32>
      %22 = vector.shape_cast %21 : vector<256xf32> to vector<256x1xf32>
      %23 = vector.broadcast %22 : vector<256x1xf32> to vector<256x128xf32>
      %24 = arith.subf %20, %23 : vector<256x128xf32>
      %25 = math.exp %24 : vector<256x128xf32>
      %cst_16 = arith.constant dense<0.000000e+00> : vector<256xf32>
      %26 = vector.multi_reduction <add>, %25, %cst_16 [1] : vector<256x128xf32> to vector<256xf32>
      %27 = vector.shape_cast %26 : vector<256xf32> to vector<256x1xf32>
      %28 = math.log %27 : vector<256x1xf32>
      %29 = vector.broadcast %28 : vector<256x1xf32> to vector<256x128xf32>
      %30 = arith.subf %24, %29 : vector<256x128xf32>
      %c0_17 = arith.constant 0 : index
      %c0_18 = arith.constant 0 : index
      %31 = vector.load %arg5[%c0_17, %c0_18] : memref<256x128xf32, #tpu.memory_space<vmem>>, vector<256x128xf32>
      tpu.vector_store %arg5[%c0_17, %c0_18], %30 {strides = array<i32>} : memref<256x128xf32, #tpu.memory_space<vmem>>, vector<256x128xf32>,
    } else {
    }
    return
  }
  func.func @transform_0(%arg0: i32, %arg1: i32) -> (i32, i32) {
    %c0_i32 = arith.constant 0 : i32
    return %arg0, %arg1 : i32, i32
  }
  func.func @transform_1(%arg0: i32, %arg1: i32) -> (i32, i32) {
    %c0_i32 = arith.constant 0 : i32
    %c0_i32_0 = arith.constant 0 : i32
    return %arg1, %c0_i32 : i32, i32
  }
  func.func @transform_2(%arg0: i32, %arg1: i32) -> (i32, i32) {
    %c0_i32 = arith.constant 0 : i32
    %c0_i32_0 = arith.constant 0 : i32
    %c0_i32_1 = arith.constant 0 : i32
    return %c0_i32, %c0_i32_0 : i32, i32
  }
  func.func @transform_3(%arg0: i32, %arg1: i32) -> (i32, i32) {
    %c0_i32 = arith.constant 0 : i32
    %c0_i32_0 = arith.constant 0 : i32
    return %arg0, %c0_i32 : i32, i32
  }
}

</mosaic_0001>

<bundles_post_ra>
// kernel: gcn_layer_forward.3
= control target key start
LH: loop header
LB: loop body
LE: loop exit
PB: predicated region body
PF: predicated region fallthrough
CT: control target
= control target key end

     0   :  { %v702_v48 = vlaneseq  ;;  %s2082_s1 = inlined_call_operand.vmem [shape: bf16[256,128], index: 1, kind: input, shape index: {}]   ;;  %s2083_s0 = inlined_call_operand.vmem [shape: bf16[256,256], index: 0, kind: input, shape index: {}]   ;;  %s2084_s2 = inlined_call_operand.vmem [shape: f32[1,128], index: 2, kind: input, shape index: {}]   ;;  %s2085_s3 = inlined_call_operand.vmem [shape: f32[256,128], index: 3, kind: output, shape index: {}]  }
   0x1   :  { %v1270_v0 = vld [vmem:[%s2082_s1 + $0x40] sm:$0xff]   ;;  %v1272_v2 = vld [vmem:[%s2082_s1 + $0x48] sm:$0xff]   ;;  %v1274_v4 = vld [vmem:[%s2082_s1 + $0x50] sm:$0xff]  }
   0x2   :  { %v1271_v1 = vld [vmem:[%s2082_s1] sm:$0xff]   ;;  %1142 = vmatprep.subr.bf16.mxu0 %v1270_v0  ;;  %1254 = vmatprep.subr.bf16.mxu1 %v1270_v0  ;;  %v1273_v3 = vld [vmem:[%s2082_s1 + $0x8] sm:$0xff]   ;;  %v1275_v5 = vld [vmem:[%s2082_s1 + $0x10] sm:$0xff]   ;;  %v1626_v49 = vand.u32 127, %v702_v48 }
   0x3   :  { %1143 = vmatpush3.bf16.msra.mxu0 %v1271_v1  ;;  %1262 = vmatpush3.bf16.msra.mxu1 %v1271_v1  ;;  %v1276_v6 = vld [vmem:[%s2082_s1 + $0x58] sm:$0xff]   ;;  %v1278_v8 = vld [vmem:[%s2082_s1 + $0x60] sm:$0xff]   ;;  %v1280_v10 = vld [vmem:[%s2082_s1 + $0x68] sm:$0xff]  }
   0x4   :  { %1144 = vmatprep.subr.bf16.mxu0 %v1272_v2  ;;  %1255 = vmatprep.subr.bf16.mxu1 %v1272_v2  ;;  %v1277_v7 = vld [vmem:[%s2082_s1 + $0x18] sm:$0xff]   ;;  %v1279_v9 = vld [vmem:[%s2082_s1 + $0x20] sm:$0xff]   ;;  %v1281_v13 = vld [vmem:[%s2082_s1 + $0x28] sm:$0xff]   ;;  %vm704_vm0 = vcmp.lt.s32.totalorder %v1626_v49, 16 }
   0x5   :  { %v1288_v11 = vld [vmem:[%s2083_s0 + $0x4] ss:$8 sps:$4 sm:$0xff]   ;;  %v1282_v14 = vld [vmem:[%s2082_s1 + $0x70] sm:$0xff]   ;;  %v1284_v16 = vld [vmem:[%s2082_s1 + $0x78] sm:$0xff]  }
   0x6   :  { %v1291_v12 = vld [vmem:[%s2083_s0 + $0x84] ss:$8 sps:$4 sm:$0xff]   ;;  %435 = vmatprep.mubr.bf16.mxu0 %v1288_v11  ;;  %v1283_v15 = vld [vmem:[%s2082_s1 + $0x30] sm:$0xff]   ;;  %v1285_v17 = vld [vmem:[%s2082_s1 + $0x38] sm:$0xff]  }
   0x7   :  { %1145 = vmatpush3.bf16.msra.mxu0 %v1273_v3  ;;  %1263 = vmatpush3.bf16.msra.mxu1 %v1273_v3  ;;  %v1286_v18 = vld [vmem:[%s2083_s0] ss:$8 sps:$4 sm:$0xff]   ;;  %v1292_v20 = vld [vmem:[%s2083_s0 + $0x14] ss:$8 sps:$4 sm:$0xff]   ;;  %v1294_v22 = vld [vmem:[%s2083_s0 + $0x10] ss:$8 sps:$4 sm:$0xff]  }
   0x8   :  { %1146 = vmatprep.subr.bf16.mxu0 %v1274_v4  ;;  %1256 = vmatprep.subr.bf16.mxu1 %v1274_v4  ;;  %v1289_v19 = vld [vmem:[%s2083_s0 + $0x80] ss:$8 sps:$4 sm:$0xff]   ;;  %v1295_v21 = vld [vmem:[%s2083_s0 + $0x94] ss:$8 sps:$4 sm:$0xff]   ;;  %v1297_v23 = vld [vmem:[%s2083_s0 + $0x90] ss:$8 sps:$4 sm:$0xff]  }
   0x9   :  { %499 = vmatprep.mubr.bf16.mxu1 %v1291_v12  ;;  %v1298_v24 = vld [vmem:[%s2083_s0 + $0x24] ss:$8 sps:$4 sm:$0xff]   ;;  %v1300_v26 = vld [vmem:[%s2083_s0 + $0x20] ss:$8 sps:$4 sm:$0xff]   ;;  %v1304_v28 = vld [vmem:[%s2083_s0 + $0x34] ss:$8 sps:$4 sm:$0xff]  }
   0xa   :  { %v1301_v25 = vld [vmem:[%s2083_s0 + $0xa4] ss:$8 sps:$4 sm:$0xff]   ;;  %v1303_v27 = vld [vmem:[%s2083_s0 + $0xa0] ss:$8 sps:$4 sm:$0xff]   ;;  %v1307_v29 = vld [vmem:[%s2083_s0 + $0xb4] ss:$8 sps:$4 sm:$0xff]  }
   0xb   :  { %1147 = vmatpush3.bf16.msra.mxu0 %v1275_v5  ;;  %1264 = vmatpush3.bf16.msra.mxu1 %v1275_v5  ;;  %v1306_v30 = vld [vmem:[%s2083_s0 + $0x30] ss:$8 sps:$4 sm:$0xff]   ;;  %v1310_v32 = vld [vmem:[%s2083_s0 + $0x44] ss:$8 sps:$4 sm:$0xff]   ;;  %v1312_v34 = vld [vmem:[%s2083_s0 + $0x40] ss:$8 sps:$4 sm:$0xff]  }
   0xc   :  { %1148 = vmatprep.subr.bf16.mxu0 %v1276_v6  ;;  %1257 = vmatprep.subr.bf16.mxu1 %v1276_v6  ;;  %v1309_v31 = vld [vmem:[%s2083_s0 + $0xb0] ss:$8 sps:$4 sm:$0xff]   ;;  %v1313_v33 = vld [vmem:[%s2083_s0 + $0xc4] ss:$8 sps:$4 sm:$0xff]   ;;  %v1315_v35 = vld [vmem:[%s2083_s0 + $0xc0] ss:$8 sps:$4 sm:$0xff]  }
   0xd   :  { %v1316_v36 = vld [vmem:[%s2083_s0 + $0x54] ss:$8 sps:$4 sm:$0xff]   ;;  %v1318_v38 = vld [vmem:[%s2083_s0 + $0x50] ss:$8 sps:$4 sm:$0xff]   ;;  %v1322_v40 = vld [vmem:[%s2083_s0 + $0x64] ss:$8 sps:$4 sm:$0xff]  }
   0xe   :  { %v1319_v37 = vld [vmem:[%s2083_s0 + $0xd4] ss:$8 sps:$4 sm:$0xff]   ;;  %v1321_v39 = vld [vmem:[%s2083_s0 + $0xd0] ss:$8 sps:$4 sm:$0xff]   ;;  %v1325_v41 = vld [vmem:[%s2083_s0 + $0xe4] ss:$8 sps:$4 sm:$0xff]  }
   0xf   :  { %1149 = vmatpush3.bf16.msra.mxu0 %v1277_v7  ;;  %1265 = vmatpush3.bf16.msra.mxu1 %v1277_v7  ;;  %v1324_v42 = vld [vmem:[%s2083_s0 + $0x60] ss:$8 sps:$4 sm:$0xff]   ;;  %v1328_v44 = vld [vmem:[%s2083_s0 + $0x74] ss:$8 sps:$4 sm:$0xff]   ;;  %v1330_v46 = vld [vmem:[%s2083_s0 + $0x70] ss:$8 sps:$4 sm:$0xff]  }
  0x10   :  { %1150 = vmatprep.subr.bf16.mxu0 %v1278_v8  ;;  %1258 = vmatprep.subr.bf16.mxu1 %v1278_v8  ;;  %v1327_v43 = vld [vmem:[%s2083_s0 + $0xe0] ss:$8 sps:$4 sm:$0xff]   ;;  %v1331_v45 = vld [vmem:[%s2083_s0 + $0xf4] ss:$8 sps:$4 sm:$0xff]   ;;  %v1333_v47 = vld [vmem:[%s2083_s0 + $0xf0] ss:$8 sps:$4 sm:$0xff]  }
  0x11   :  { %v1631_v54 = vld [vmem:[%s2084_s2] ss:$0 sm:$0xff] }
  0x13   :  { %1151 = vmatpush3.bf16.msra.mxu0 %v1279_v9  ;;  %1266 = vmatpush3.bf16.msra.mxu1 %v1279_v9 }
  0x14   :  { %1152 = vmatprep.subr.bf16.mxu0 %v1280_v10  ;;  %1259 = vmatprep.subr.bf16.mxu1 %v1280_v10 }
  0x17   :  { %1153 = vmatpush3.bf16.msra.mxu0 %v1281_v13  ;;  %1267 = vmatpush3.bf16.msra.mxu1 %v1281_v13 }
  0x18   :  { %1154 = vmatprep.subr.bf16.mxu0 %v1282_v14  ;;  %1260 = vmatprep.subr.bf16.mxu1 %v1282_v14 }
  0x1b   :  { %1155 = vmatpush3.bf16.msra.mxu0 %v1283_v15  ;;  %1268 = vmatpush3.bf16.msra.mxu1 %v1283_v15 }
  0x1c   :  { %1156 = vmatprep.subr.bf16.mxu0 %v1284_v16  ;;  %1261 = vmatprep.subr.bf16.mxu1 %v1284_v16 }
  0x1f   :  { %1157 = vmatpush3.bf16.msra.mxu0 %v1285_v17  ;;  %1269 = vmatpush3.bf16.msra.mxu1 %v1285_v17 }
  0x22   :  { %436 = vmatmul.mubr.bf16.vlgmr.msra.gmra.mrb[0].mxu0 %v1286_v18  ;;  %500 = vmatmul.mubr.bf16.vlgmr.msra.gmra.mrb[0].mxu1 %v1289_v19 }
  0x23   :  { %443 = vmatprep.mubr.bf16.mxu0 %v1292_v20  ;;  %507 = vmatprep.mubr.bf16.mxu1 %v1295_v21 }
  0x2a   :  { %444 = vmatmul.mubr.bf16.gmra.mrb[4].mxu0 %v1294_v22  ;;  %508 = vmatmul.mubr.bf16.gmra.mrb[4].mxu1 %v1297_v23 }
  0x2b   :  { %451 = vmatprep.mubr.bf16.mxu0 %v1298_v24  ;;  %515 = vmatprep.mubr.bf16.mxu1 %v1301_v25 }
  0x32   :  { %452 = vmatmul.mubr.bf16.gmra.mrb[8].mxu0 %v1300_v26  ;;  %516 = vmatmul.mubr.bf16.gmra.mrb[8].mxu1 %v1303_v27 }
  0x33   :  { %459 = vmatprep.mubr.bf16.mxu0 %v1304_v28  ;;  %523 = vmatprep.mubr.bf16.mxu1 %v1307_v29 }
  0x3a   :  { %460 = vmatmul.mubr.bf16.gmra.mrb[12].mxu0 %v1306_v30  ;;  %524 = vmatmul.mubr.bf16.gmra.mrb[12].mxu1 %v1309_v31 }
  0x3b   :  { %467 = vmatprep.mubr.bf16.mxu0 %v1310_v32  ;;  %531 = vmatprep.mubr.bf16.mxu1 %v1313_v33 }
  0x42   :  { %468 = vmatmul.mubr.bf16.gmra.mrb[16].mxu0 %v1312_v34  ;;  %532 = vmatmul.mubr.bf16.gmra.mrb[16].mxu1 %v1315_v35 }
  0x43   :  { %475 = vmatprep.mubr.bf16.mxu0 %v1316_v36  ;;  %539 = vmatprep.mubr.bf16.mxu1 %v1319_v37 }
  0x4a   :  { %476 = vmatmul.mubr.bf16.gmra.mrb[20].mxu0 %v1318_v38  ;;  %540 = vmatmul.mubr.bf16.gmra.mrb[20].mxu1 %v1321_v39 }
  0x4b   :  { %483 = vmatprep.mubr.bf16.mxu0 %v1322_v40  ;;  %547 = vmatprep.mubr.bf16.mxu1 %v1325_v41 }
  0x52   :  { %484 = vmatmul.mubr.bf16.gmra.mrb[24].mxu0 %v1324_v42  ;;  %548 = vmatmul.mubr.bf16.gmra.mrb[24].mxu1 %v1327_v43 }
  0x53   :  { %491 = vmatprep.mubr.bf16.mxu0 %v1328_v44  ;;  %555 = vmatprep.mubr.bf16.mxu1 %v1331_v45 }
  0x5a   :  { %492 = vmatmul.mubr.bf16.gmra.mrb[28].mxu0 %v1330_v46  ;;  %556 = vmatmul.mubr.bf16.gmra.mrb[28].mxu1 %v1333_v47 }
  0xf5   :  { %v1158_v50 = vpop.f32.mrb[0].mxu0  ;;  %v1206_v51 = vpop.f32.mrb[0].mxu1 }
  0xf6   :  { %v1159_v52 = vpop.f32.mrb[1].mxu0  ;;  %v1207_v53 = vpop.f32.mrb[1].mxu1 }
  0xf7   :  { %v1160_v55 = vadd.f32 %v1159_v52, %v1158_v50  ;;  %v1208_v56 = vadd.f32 %v1207_v53, %v1206_v51  ;;  %v1161_v57 = vpop.f32.mrb[2].mxu0  ;;  %v1209_v58 = vpop.f32.mrb[2].mxu1 }
  0xf8   :  { %v1162_v59 = vpop.f32.mrb[3].mxu0  ;;  %v1210_v60 = vpop.f32.mrb[3].mxu1 }
  0xf9   :  { %v1163_v61 = vadd.f32 %v1162_v59, %v1161_v57  ;;  %v1211_v62 = vadd.f32 %v1210_v60, %v1209_v58  ;;  %v670_v63 = vadd.f32 %v1160_v55, %v1631_v54  ;;  %v686_v0 = vadd.f32 %v1208_v56, %v1631_v54 }
  0xfb   :  { %v1638_v1 = vsel %vm704_vm0, %v670_v63, -1e+30  ;;  %v687_v2 = vadd.f32 %v1211_v62, %v1631_v54  ;;  %v1648_v5 = vsel %vm704_vm0, %v686_v0, -1e+30  ;;  %v671_v12 = vadd.f32 %v1163_v61, %v1631_v54 }
  0xfc   :  { %737 = vmax.xlane.f32.xlu0 %v1638_v1 }
  0xfd   :  { %v1164_v3 = vpop.f32.mrb[4].mxu0  ;;  %v1644_v4 = vsel %vm704_vm0, %v687_v2, -1e+30  ;;  %v1212_v6 = vpop.f32.mrb[4].mxu1  ;;  %v1661_v21 = vsel %vm704_vm0, %v671_v12, -1e+30 }
  0xfe   :  { %771 = vmax.xlane.f32.xlu1 %v1644_v4  ;;  %v1165_v7 = vpop.f32.mrb[5].mxu0  ;;  %v1213_v8 = vpop.f32.mrb[5].mxu1 }
  0xff   :  { %v1166_v9 = vadd.f32 %v1165_v7, %v1164_v3  ;;  %v1167_v10 = vpop.f32.mrb[6].mxu0  ;;  %v1214_v11 = vadd.f32 %v1213_v8, %v1212_v6  ;;  %v1215_v13 = vpop.f32.mrb[6].mxu1 }
 0x100   :  { %769 = vmax.xlane.f32.xlu0 %v1648_v5  ;;  %v1168_v14 = vpop.f32.mrb[7].mxu0  ;;  %v1216_v15 = vpop.f32.mrb[7].mxu1 }
 0x101   :  { %v1169_v16 = vadd.f32 %v1168_v14, %v1167_v10  ;;  %v672_v17 = vadd.f32 %v1166_v9, %v1631_v54  ;;  %v1217_v18 = vadd.f32 %v1216_v15, %v1215_v13  ;;  %v688_v19 = vadd.f32 %v1214_v11, %v1631_v54 }
 0x103   :  { %v1657_v20 = vsel %vm704_vm0, %v672_v17, -1e+30  ;;  %v673_v22 = vadd.f32 %v1169_v16, %v1631_v54  ;;  %v689_v23 = vadd.f32 %v1217_v18, %v1631_v54  ;;  %v1673_v26 = vsel %vm704_vm0, %v688_v19, -1e+30 }
 0x104   :  { %741 = vmax.xlane.f32.xlu1 %v1657_v20  ;;  %739 = vmax.xlane.f32.xlu0 %v1661_v21 }
 0x105   :  { %v1170_v24 = vpop.f32.mrb[8].mxu0  ;;  %v1669_v25 = vsel %vm704_vm0, %v673_v22, -1e+30  ;;  %v1218_v27 = vpop.f32.mrb[8].mxu1  ;;  %v1679_v35 = vsel %vm704_vm0, %v689_v23, -1e+30 }
 0x106   :  { %v1171_v28 = vpop.f32.mrb[9].mxu0  ;;  %v1219_v29 = vpop.f32.mrb[9].mxu1 }
 0x107   :  { %v1172_v30 = vadd.f32 %v1171_v28, %v1170_v24  ;;  %v1173_v31 = vpop.f32.mrb[10].mxu0  ;;  %v1220_v32 = vadd.f32 %v1219_v29, %v1218_v27  ;;  %v1221_v33 = vpop.f32.mrb[10].mxu1 }
 0x108   :  { %743 = vmax.xlane.f32.xlu1 %v1669_v25  ;;  %773 = vmax.xlane.f32.xlu0 %v1673_v26  ;;  %v1174_v34 = vpop.f32.mrb[11].mxu0  ;;  %v1222_v36 = vpop.f32.mrb[11].mxu1 }
 0x109   :  { %v1175_v37 = vadd.f32 %v1174_v34, %v1173_v31  ;;  %v674_v38 = vadd.f32 %v1172_v30, %v1631_v54  ;;  %v1223_v39 = vadd.f32 %v1222_v36, %v1221_v33  ;;  %v690_v40 = vadd.f32 %v1220_v32, %v1631_v54 }
 0x10b   :  { %v1685_v41 = vsel %vm704_vm0, %v674_v38, -1e+30  ;;  %v675_v42 = vadd.f32 %v1175_v37, %v1631_v54  ;;  %v691_v43 = vadd.f32 %v1223_v39, %v1631_v54  ;;  %v1697_v46 = vsel %vm704_vm0, %v690_v40, -1e+30 }
 0x10c   :  { %775 = vmax.xlane.f32.xlu1 %v1679_v35  ;;  %745 = vmax.xlane.f32.xlu0 %v1685_v41 }
 0x10d   :  { %v1176_v44 = vpop.f32.mrb[12].mxu0  ;;  %v1693_v45 = vsel %vm704_vm0, %v675_v42, -1e+30  ;;  %v1224_v47 = vpop.f32.mrb[12].mxu1  ;;  %v1703_v57 = vsel %vm704_vm0, %v691_v43, -1e+30 }
 0x10e   :  { %v1177_v48 = vpop.f32.mrb[13].mxu0  ;;  %v1225_v50 = vpop.f32.mrb[13].mxu1 }
 0x10f   :  { %v1178_v51 = vadd.f32 %v1177_v48, %v1176_v44  ;;  %v1179_v52 = vpop.f32.mrb[14].mxu0  ;;  %v1226_v53 = vadd.f32 %v1225_v50, %v1224_v47  ;;  %v1227_v55 = vpop.f32.mrb[14].mxu1 }
 0x110   :  { %747 = vmax.xlane.f32.xlu1 %v1693_v45  ;;  %777 = vmax.xlane.f32.xlu0 %v1697_v46  ;;  %v1180_v56 = vpop.f32.mrb[15].mxu0  ;;  %v1228_v58 = vpop.f32.mrb[15].mxu1 }
 0x111   :  { %v1181_v59 = vadd.f32 %v1180_v56, %v1179_v52  ;;  %v676_v60 = vadd.f32 %v1178_v51, %v1631_v54  ;;  %v1229_v61 = vadd.f32 %v1228_v58, %v1227_v55  ;;  %v692_v62 = vadd.f32 %v1226_v53, %v1631_v54 }
 0x113   :  { %v1709_v63 = vsel %vm704_vm0, %v676_v60, -1e+30  ;;  %v677_v0 = vadd.f32 %v1181_v59, %v1631_v54  ;;  %v693_v2 = vadd.f32 %v1229_v61, %v1631_v54  ;;  %v1721_v7 = vsel %vm704_vm0, %v692_v62, -1e+30 }
 0x114   :  { %779 = vmax.xlane.f32.xlu1 %v1703_v57  ;;  %749 = vmax.xlane.f32.xlu0 %v1709_v63 }
 0x115   :  { %v1182_v3 = vpop.f32.mrb[16].mxu0  ;;  %v1717_v6 = vsel %vm704_vm0, %v677_v0, -1e+30  ;;  %v1230_v8 = vpop.f32.mrb[16].mxu1  ;;  %v1727_v16 = vsel %vm704_vm0, %v693_v2, -1e+30 }
 0x116   :  { %v1183_v9 = vpop.f32.mrb[17].mxu0  ;;  %v1231_v10 = vpop.f32.mrb[17].mxu1 }
 0x117   :  { %v1184_v11 = vadd.f32 %v1183_v9, %v1182_v3  ;;  %v1185_v12 = vpop.f32.mrb[18].mxu0  ;;  %v1232_v13 = vadd.f32 %v1231_v10, %v1230_v8  ;;  %v1233_v14 = vpop.f32.mrb[18].mxu1 }
 0x118   :  { %751 = vmax.xlane.f32.xlu1 %v1717_v6  ;;  %781 = vmax.xlane.f32.xlu0 %v1721_v7  ;;  %v1186_v15 = vpop.f32.mrb[19].mxu0  ;;  %v1234_v17 = vpop.f32.mrb[19].mxu1 }
 0x119   :  { %v1187_v18 = vadd.f32 %v1186_v15, %v1185_v12  ;;  %v678_v19 = vadd.f32 %v1184_v11, %v1631_v54  ;;  %v1235_v22 = vadd.f32 %v1234_v17, %v1233_v14  ;;  %v694_v23 = vadd.f32 %v1232_v13, %v1631_v54 }
 0x11b   :  { %v1733_v24 = vsel %vm704_vm0, %v678_v19, -1e+30  ;;  %v679_v27 = vadd.f32 %v1187_v18, %v1631_v54  ;;  %v695_v28 = vadd.f32 %v1235_v22, %v1631_v54  ;;  %v1745_v31 = vsel %vm704_vm0, %v694_v23, -1e+30 }
 0x11c   :  { %783 = vmax.xlane.f32.xlu1 %v1727_v16  ;;  %753 = vmax.xlane.f32.xlu0 %v1733_v24 }
 0x11d   :  { %v1188_v29 = vpop.f32.mrb[20].mxu0  ;;  %v1741_v30 = vsel %vm704_vm0, %v679_v27, -1e+30  ;;  %v1236_v32 = vpop.f32.mrb[20].mxu1  ;;  %v1751_v42 = vsel %vm704_vm0, %v695_v28, -1e+30 }
 0x11e   :  { %v1189_v33 = vpop.f32.mrb[21].mxu0  ;;  %v1237_v34 = vpop.f32.mrb[21].mxu1 }
 0x11f   :  { %v1190_v36 = vadd.f32 %v1189_v33, %v1188_v29  ;;  %v1191_v37 = vpop.f32.mrb[22].mxu0  ;;  %v1238_v38 = vadd.f32 %v1237_v34, %v1236_v32  ;;  %v1239_v39 = vpop.f32.mrb[22].mxu1 }
 0x120   :  { %755 = vmax.xlane.f32.xlu1 %v1741_v30  ;;  %785 = vmax.xlane.f32.xlu0 %v1745_v31  ;;  %v1192_v40 = vpop.f32.mrb[23].mxu0  ;;  %v1240_v43 = vpop.f32.mrb[23].mxu1 }
 0x121   :  { %v1193_v44 = vadd.f32 %v1192_v40, %v1191_v37  ;;  %v680_v47 = vadd.f32 %v1190_v36, %v1631_v54  ;;  %v1241_v48 = vadd.f32 %v1240_v43, %v1239_v39  ;;  %v696_v50 = vadd.f32 %v1238_v38, %v1631_v54 }
 0x123   :  { %v1757_v51 = vsel %vm704_vm0, %v680_v47, -1e+30  ;;  %v681_v52 = vadd.f32 %v1193_v44, %v1631_v54  ;;  %v697_v53 = vadd.f32 %v1241_v48, %v1631_v54  ;;  %v1769_v58 = vsel %vm704_vm0, %v696_v50, -1e+30 }
 0x124   :  { %787 = vmax.xlane.f32.xlu1 %v1751_v42  ;;  %757 = vmax.xlane.f32.xlu0 %v1757_v51 }
 0x125   :  { %v1194_v55 = vpop.f32.mrb[24].mxu0  ;;  %v1765_v56 = vsel %vm704_vm0, %v681_v52, -1e+30  ;;  %v1242_v59 = vpop.f32.mrb[24].mxu1  ;;  %v1775_v9 = vsel %vm704_vm0, %v697_v53, -1e+30 }
 0x126   :  { %v1195_v60 = vpop.f32.mrb[25].mxu0  ;;  %v1243_v61 = vpop.f32.mrb[25].mxu1 }
 0x127   :  { %v1196_v62 = vadd.f32 %v1195_v60, %v1194_v55  ;;  %v1197_v0 = vpop.f32.mrb[26].mxu0  ;;  %v1244_v2 = vadd.f32 %v1243_v61, %v1242_v59  ;;  %v1245_v3 = vpop.f32.mrb[26].mxu1 }
 0x128   :  { %759 = vmax.xlane.f32.xlu1 %v1765_v56  ;;  %789 = vmax.xlane.f32.xlu0 %v1769_v58  ;;  %v1198_v8 = vpop.f32.mrb[27].mxu0  ;;  %v1246_v10 = vpop.f32.mrb[27].mxu1 }
 0x129   :  { %v1199_v11 = vadd.f32 %v1198_v8, %v1197_v0  ;;  %v682_v12 = vadd.f32 %v1196_v62, %v1631_v54  ;;  %v1247_v13 = vadd.f32 %v1246_v10, %v1245_v3  ;;  %v698_v14 = vadd.f32 %v1244_v2, %v1631_v54 }
 0x12b   :  { %v1781_v15 = vsel %vm704_vm0, %v682_v12, -1e+30  ;;  %v683_v17 = vadd.f32 %v1199_v11, %v1631_v54  ;;  %v699_v18 = vadd.f32 %v1247_v13, %v1631_v54  ;;  %v1793_v23 = vsel %vm704_vm0, %v698_v14, -1e+30 }
 0x12c   :  { %791 = vmax.xlane.f32.xlu1 %v1775_v9  ;;  %761 = vmax.xlane.f32.xlu0 %v1781_v15 }
 0x12d   :  { %v1200_v19 = vpop.f32.mrb[28].mxu0  ;;  %v1789_v22 = vsel %vm704_vm0, %v683_v17, -1e+30  ;;  %v1248_v27 = vpop.f32.mrb[28].mxu1  ;;  %v1799_v38 = vsel %vm704_vm0, %v699_v18, -1e+30 }
 0x12e   :  { %v1201_v28 = vpop.f32.mrb[29].mxu0  ;;  %v1249_v29 = vpop.f32.mrb[29].mxu1 }
 0x12f   :  { %v1202_v32 = vadd.f32 %v1201_v28, %v1200_v19  ;;  %v1203_v33 = vpop.f32.mrb[30].mxu0  ;;  %v1250_v34 = vadd.f32 %v1249_v29, %v1248_v27  ;;  %v1251_v36 = vpop.f32.mrb[30].mxu1 }
 0x130   :  { %763 = vmax.xlane.f32.xlu1 %v1789_v22  ;;  %793 = vmax.xlane.f32.xlu0 %v1793_v23  ;;  %v1204_v37 = vpop.f32.mrb[31].mxu0  ;;  %v1252_v39 = vpop.f32.mrb[31].mxu1 }
 0x131   :  { %v1205_v40 = vadd.f32 %v1204_v37, %v1203_v33  ;;  %v684_v43 = vadd.f32 %v1202_v32, %v1631_v54  ;;  %v1253_v44 = vadd.f32 %v1252_v39, %v1251_v36  ;;  %v700_v47 = vadd.f32 %v1250_v34, %v1631_v54 }
 0x133   :  { %v1805_v48 = vsel %vm704_vm0, %v684_v43, -1e+30  ;;  %v685_v50 = vadd.f32 %v1205_v40, %v1631_v54  ;;  %v701_v52 = vadd.f32 %v1253_v44, %v1631_v54  ;;  %v1817_v55 = vsel %vm704_vm0, %v700_v47, -1e+30 }
 0x134   :  { %795 = vmax.xlane.f32.xlu1 %v1799_v38  ;;  %765 = vmax.xlane.f32.xlu0 %v1805_v48 }
 0x135   :  { %v1813_v53 = vsel %vm704_vm0, %v685_v50, -1e+30  ;;  %v1821_v59 = vsel %vm704_vm0, %v701_v52, -1e+30 }
 0x138   :  { %767 = vmax.xlane.f32.xlu1 %v1813_v53  ;;  %797 = vmax.xlane.f32.xlu0 %v1817_v55 }
 0x13c   :  { %799 = vmax.xlane.f32.xlu1 %v1821_v59 }
 0x189   :  { %v738_v54 = vpop.xlane.xlu0 %737 }
 0x18a   :  { %v1827_v60 = vsub.f32 %v1638_v1, %v738_v54 }
 0x18b   :  { %v772_v62 = vpop.xlane.xlu1 %771 }
 0x18c   :  { %v833_v61 = vmul.f32 1.442695, %v1827_v60  ;;  %v1835_v10 = vsub.f32 %v1644_v4, %v772_v62 }
 0x18d   :  { %v770_v0 = vpop.xlane.xlu0 %769 }
 0x18e   :  { %1334 = vpow2.f32 %v833_v61  ;;  %v1831_v2 = vsub.f32 %v1648_v5, %v770_v0  ;;  %v867_v17 = vmul.f32 1.442695, %v1835_v10 }
 0x190   :  { %v865_v49 = vmul.f32 1.442695, %v1831_v2 }
 0x191   :  { %v742_v3 = vpop.xlane.xlu1 %741  ;;  %v740_v8 = vpop.xlane.xlu0 %739 }
 0x192   :  { %1336 = vpow2.f32 %v865_v49  ;;  %v1838_v11 = vsub.f32 %v1657_v20, %v742_v3  ;;  %v1841_v1 = vsub.f32 %v1661_v21, %v740_v8 }
 0x194   :  { %v837_v12 = vmul.f32 1.442695, %v1838_v11  ;;  %v835_v13 = vmul.f32 1.442695, %v1841_v1 }
 0x195   :  { %v744_v5 = vpop.xlane.xlu1 %743  ;;  %v774_v14 = vpop.xlane.xlu0 %773 }
 0x196   :  { %1338 = vpow2.f32 %v837_v12  ;;  %v1847_v18 = vsub.f32 %v1669_v25, %v744_v5  ;;  %v1850_v4 = vsub.f32 %v1673_v26, %v774_v14 }
 0x197   :  { %1340 = vpow2.f32 %v835_v13 }
 0x198   :  { %v1335_v20 = vpop.eup %1334  ;;  %v869_v21 = vmul.f32 1.442695, %v1850_v4  ;;  %1342 = vpow2.f32 %v867_v17  ;;  %v839_v28 = vmul.f32 1.442695, %v1847_v18 }
 0x199   :  { %v776_v19 = vpop.xlane.xlu1 %775  ;;  %897 = vadd.xlane.f32.xlu0 %v1335_v20  ;;  %v746_v27 = vpop.xlane.xlu0 %745 }
 0x19a   :  { %v1855_v29 = vsub.f32 %v1679_v35, %v776_v19  ;;  %v1858_v32 = vsub.f32 %v1685_v41, %v746_v27  ;;  %1344 = vpow2.f32 %v869_v21 }
 0x19b   :  { %1346 = vpow2.f32 %v839_v28 }
 0x19c   :  { %v1337_v25 = vpop.eup %1336  ;;  %v841_v26 = vmul.f32 1.442695, %v1858_v32  ;;  %v871_v36 = vmul.f32 1.442695, %v1855_v29 }
 0x19d   :  { %v748_v33 = vpop.xlane.xlu1 %747  ;;  %929 = vadd.xlane.f32.xlu0 %v1337_v25  ;;  %v778_v34 = vpop.xlane.xlu0 %777 }
 0x19e   :  { %v1863_v37 = vsub.f32 %v1693_v45, %v748_v33  ;;  %v1866_v39 = vsub.f32 %v1697_v46, %v778_v34  ;;  %1348 = vpow2.f32 %v841_v26 }
 0x19f   :  { %1350 = vpow2.f32 %v871_v36 }
 0x1a0   :  { %v1339_v35 = vpop.eup %1338  ;;  %v873_v41 = vmul.f32 1.442695, %v1866_v39  ;;  %v843_v47 = vmul.f32 1.442695, %v1863_v37 }
 0x1a1   :  { %v1341_v40 = vpop.eup %1340  ;;  %v780_v43 = vpop.xlane.xlu1 %779  ;;  %901 = vadd.xlane.f32.xlu0 %v1339_v35 }
 0x1a2   :  { %v750_v44 = vpop.xlane.xlu0 %749  ;;  %v1871_v50 = vsub.f32 %v1703_v57, %v780_v43  ;;  %899 = vadd.xlane.f32.xlu1 %v1341_v40  ;;  %1352 = vpow2.f32 %v873_v41  ;;  %v1343_v46 = vpop.eup %1342 }
 0x1a3   :  { %v1874_v45 = vsub.f32 %v1709_v63, %v750_v44  ;;  %1354 = vpow2.f32 %v843_v47 }
 0x1a4   :  { %v1345_v54 = vpop.eup %1344  ;;  %v875_v0 = vmul.f32 1.442695, %v1871_v50 }
 0x1a5   :  { %v845_v52 = vmul.f32 1.442695, %v1874_v45  ;;  %v752_v61 = vpop.xlane.xlu1 %751  ;;  %933 = vadd.xlane.f32.xlu0 %v1345_v54  ;;  %v1347_v63 = vpop.eup %1346 }
 0x1a6   :  { %v782_v62 = vpop.xlane.xlu0 %781  ;;  %v1879_v49 = vsub.f32 %v1717_v6, %v752_v61  ;;  %931 = vadd.xlane.f32.xlu1 %v1343_v46 }
 0x1a7   :  { %v1882_v57 = vsub.f32 %v1721_v7, %v782_v62  ;;  %1356 = vpow2.f32 %v845_v52 }
 0x1a8   :  { %v1349_v8 = vpop.eup %1348  ;;  %1358 = vpow2.f32 %v875_v0  ;;  %v847_v5 = vmul.f32 1.442695, %v1879_v49 }
 0x1a9   :  { %v877_v3 = vmul.f32 1.442695, %v1882_v57  ;;  %v784_v12 = vpop.xlane.xlu1 %783  ;;  %905 = vadd.xlane.f32.xlu0 %v1349_v8  ;;  %v1351_v7 = vpop.eup %1350 }
 0x1aa   :  { %v754_v13 = vpop.xlane.xlu0 %753  ;;  %v1887_v14 = vsub.f32 %v1727_v16, %v784_v12  ;;  %903 = vadd.xlane.f32.xlu1 %v1347_v63 }
 0x1ab   :  { %v1890_v6 = vsub.f32 %v1733_v24, %v754_v13  ;;  %1360 = vpow2.f32 %v877_v3 }
 0x1ac   :  { %v1353_v20 = vpop.eup %1352  ;;  %1362 = vpow2.f32 %v847_v5  ;;  %v879_v27 = vmul.f32 1.442695, %v1887_v14 }
 0x1ad   :  { %v849_v17 = vmul.f32 1.442695, %v1890_v6  ;;  %v756_v21 = vpop.xlane.xlu1 %755  ;;  %937 = vadd.xlane.f32.xlu0 %v1353_v20  ;;  %v1355_v24 = vpop.eup %1354 }
 0x1ae   :  { %v786_v19 = vpop.xlane.xlu0 %785  ;;  %v1895_v28 = vsub.f32 %v1741_v30, %v756_v21  ;;  %935 = vadd.xlane.f32.xlu1 %v1351_v7 }
 0x1af   :  { %v1898_v16 = vsub.f32 %v1745_v31, %v786_v19  ;;  %1364 = vpow2.f32 %v849_v17 }
 0x1b0   :  { %1366 = vpow2.f32 %v879_v27  ;;  %v851_v36 = vmul.f32 1.442695, %v1895_v28 }
 0x1b1   :  { %v881_v25 = vmul.f32 1.442695, %v1898_v16  ;;  %v1357_v26 = vpop.eup %1356  ;;  %v788_v33 = vpop.xlane.xlu1 %787 }
 0x1b2   :  { %v758_v34 = vpop.xlane.xlu0 %757  ;;  %v1903_v35 = vsub.f32 %v1751_v42, %v788_v33  ;;  %907 = vadd.xlane.f32.xlu1 %v1355_v24  ;;  %909 = vadd.xlane.f32.xlu0 %v1357_v26  ;;  %v1359_v31 = vpop.eup %1358 }
 0x1b3   :  { %v1906_v30 = vsub.f32 %v1757_v51, %v758_v34  ;;  %1368 = vpow2.f32 %v881_v25 }
 0x1b4   :  { %1370 = vpow2.f32 %v851_v36  ;;  %v883_v47 = vmul.f32 1.442695, %v1903_v35 }
 0x1b5   :  { %v853_v41 = vmul.f32 1.442695, %v1906_v30  ;;  %v1361_v40 = vpop.eup %1360  ;;  %v760_v43 = vpop.xlane.xlu1 %759 }
 0x1b6   :  { %v790_v44 = vpop.xlane.xlu0 %789  ;;  %v1911_v46 = vsub.f32 %v1765_v56, %v760_v43  ;;  %939 = vadd.xlane.f32.xlu1 %v1359_v31  ;;  %941 = vadd.xlane.f32.xlu0 %v1361_v40  ;;  %v1363_v51 = vpop.eup %1362 }
 0x1b7   :  { %v1914_v42 = vsub.f32 %v1769_v58, %v790_v44  ;;  %1372 = vpow2.f32 %v853_v41 }
 0x1b8   :  { %1374 = vpow2.f32 %v883_v47  ;;  %v855_v0 = vmul.f32 1.442695, %v1911_v46 }
 0x1b9   :  { %v885_v52 = vmul.f32 1.442695, %v1914_v42  ;;  %v1365_v54 = vpop.eup %1364  ;;  %v792_v61 = vpop.xlane.xlu1 %791 }
 0x1ba   :  { %v762_v62 = vpop.xlane.xlu0 %761  ;;  %v1919_v63 = vsub.f32 %v1775_v9, %v792_v61  ;;  %911 = vadd.xlane.f32.xlu1 %v1363_v51  ;;  %913 = vadd.xlane.f32.xlu0 %v1365_v54  ;;  %v1367_v58 = vpop.eup %1366 }
 0x1bb   :  { %v1922_v56 = vsub.f32 %v1781_v15, %v762_v62  ;;  %1376 = vpow2.f32 %v885_v52 }
 0x1bc   :  { %1378 = vpow2.f32 %v855_v0  ;;  %v887_v5 = vmul.f32 1.442695, %v1919_v63 }
 0x1bd   :  { %v857_v3 = vmul.f32 1.442695, %v1922_v56  ;;  %v1369_v8 = vpop.eup %1368  ;;  %v764_v12 = vpop.xlane.xlu1 %763 }
 0x1be   :  { %v794_v13 = vpop.xlane.xlu0 %793  ;;  %v1927_v7 = vsub.f32 %v1789_v22, %v764_v12  ;;  %943 = vadd.xlane.f32.xlu1 %v1367_v58  ;;  %945 = vadd.xlane.f32.xlu0 %v1369_v8  ;;  %v1371_v15 = vpop.eup %1370 }
 0x1bf   :  { %v1930_v9 = vsub.f32 %v1793_v23, %v794_v13  ;;  %1380 = vpow2.f32 %v857_v3 }
 0x1c0   :  { %1382 = vpow2.f32 %v887_v5  ;;  %v859_v27 = vmul.f32 1.442695, %v1927_v7 }
 0x1c1   :  { %v889_v17 = vmul.f32 1.442695, %v1930_v9  ;;  %v1373_v20 = vpop.eup %1372  ;;  %v796_v21 = vpop.xlane.xlu1 %795 }
 0x1c2   :  { %v766_v19 = vpop.xlane.xlu0 %765  ;;  %v1935_v24 = vsub.f32 %v1799_v38, %v796_v21  ;;  %915 = vadd.xlane.f32.xlu1 %v1371_v15  ;;  %917 = vadd.xlane.f32.xlu0 %v1373_v20  ;;  %v1375_v23 = vpop.eup %1374 }
 0x1c3   :  { %v1938_v22 = vsub.f32 %v1805_v48, %v766_v19  ;;  %1384 = vpow2.f32 %v889_v17 }
 0x1c4   :  { %1386 = vpow2.f32 %v859_v27  ;;  %v891_v36 = vmul.f32 1.442695, %v1935_v24 }
 0x1c5   :  { %v861_v25 = vmul.f32 1.442695, %v1938_v22  ;;  %v1377_v26 = vpop.eup %1376  ;;  %v768_v33 = vpop.xlane.xlu1 %767 }
 0x1c6   :  { %v798_v34 = vpop.xlane.xlu0 %797  ;;  %947 = vadd.xlane.f32.xlu1 %v1375_v23  ;;  %949 = vadd.xlane.f32.xlu0 %v1377_v26  ;;  %v1946_v31 = vsub.f32 %v1813_v53, %v768_v33  ;;  %v1379_v48 = vpop.eup %1378 }
 0x1c7   :  { %v1943_v38 = vsub.f32 %v1817_v55, %v798_v34  ;;  %1388 = vpow2.f32 %v861_v25 }
 0x1c8   :  { %1390 = vpow2.f32 %v891_v36  ;;  %v863_v44 = vmul.f32 1.442695, %v1946_v31 }
 0x1c9   :  { %v893_v41 = vmul.f32 1.442695, %v1943_v38  ;;  %v1381_v40 = vpop.eup %1380  ;;  %v800_v43 = vpop.xlane.xlu1 %799 }
 0x1ca   :  { %919 = vadd.xlane.f32.xlu1 %v1379_v48  ;;  %921 = vadd.xlane.f32.xlu0 %v1381_v40  ;;  %v1951_v47 = vsub.f32 %v1821_v59, %v800_v43  ;;  %v1383_v55 = vpop.eup %1382 }
 0x1cb   :  { %1392 = vpow2.f32 %v893_v41 }
 0x1cc   :  { %1394 = vpow2.f32 %v863_v44  ;;  %v895_v53 = vmul.f32 1.442695, %v1951_v47 }
 0x1cd   :  { %v1385_v51 = vpop.eup %1384 }
 0x1ce   :  { %951 = vadd.xlane.f32.xlu1 %v1383_v55  ;;  %953 = vadd.xlane.f32.xlu0 %v1385_v51  ;;  %v1387_v52 = vpop.eup %1386  ;;  %1396 = vpow2.f32 %v895_v53 }
 0x1d1   :  { %v1389_v54 = vpop.eup %1388 }
 0x1d2   :  { %923 = vadd.xlane.f32.xlu1 %v1387_v52  ;;  %925 = vadd.xlane.f32.xlu0 %v1389_v54  ;;  %v1391_v61 = vpop.eup %1390 }
 0x1d5   :  { %v1393_v62 = vpop.eup %1392 }
 0x1d6   :  { %955 = vadd.xlane.f32.xlu1 %v1391_v61  ;;  %957 = vadd.xlane.f32.xlu0 %v1393_v62  ;;  %v1395_v0 = vpop.eup %1394 }
 0x1d8   :  { %v1397_v59 = vpop.eup %1396 }
 0x1da   :  { %927 = vadd.xlane.f32.xlu1 %v1395_v0 }
 0x1de   :  { %959 = vadd.xlane.f32.xlu1 %v1397_v59 }
 0x226   :  { %v898_v58 = vpop.xlane.xlu0 %897 }
 0x227   :  { %1398 = vlog2.f32 %v898_v58 }
 0x22a   :  { %v930_v3 = vpop.xlane.xlu0 %929 }
 0x22b   :  { %1400 = vlog2.f32 %v930_v3 }
 0x22e   :  { %v902_v8 = vpop.xlane.xlu0 %901 }
 0x22f   :  { %v900_v12 = vpop.xlane.xlu1 %899  ;;  %1402 = vlog2.f32 %v902_v8 }
 0x230   :  { %1404 = vlog2.f32 %v900_v12 }
 0x231   :  { %v1399_v13 = vpop.eup %1398 }
 0x232   :  { %v962_v5 = vmul.f32 0.6931472, %v1399_v13  ;;  %v934_v17 = vpop.xlane.xlu0 %933 }
 0x233   :  { %v932_v15 = vpop.xlane.xlu1 %931 }
 0x234   :  { %v1025_v20 = vsub.f32 %v1827_v60, %v962_v5  ;;  %1406 = vlog2.f32 %v932_v15 }
 0x235   :  { %v1401_v21 = vpop.eup %1400  ;;  %1408 = vlog2.f32 %v934_v17 }
 0x236   :  { %1057 = vst [vmem:[%s2085_s3] sm:$0xff] %v1025_v20  ;;  %v994_v19 = vmul.f32 0.6931472, %v1401_v21  ;;  %v906_v23 = vpop.xlane.xlu0 %905 }
 0x237   :  { %v904_v27 = vpop.xlane.xlu1 %903 }
 0x238   :  { %v1041_v25 = vsub.f32 %v1831_v2, %v994_v19  ;;  %1410 = vlog2.f32 %v904_v27 }
 0x239   :  { %v1403_v26 = vpop.eup %1402  ;;  %1412 = vlog2.f32 %v906_v23 }
 0x23a   :  { %v1405_v33 = vpop.eup %1404  ;;  %1073 = vst [vmem:[%s2085_s3 + $0x80] sm:$0xff] %v1041_v25  ;;  %v966_v60 = vmul.f32 0.6931472, %v1403_v26  ;;  %v938_v48 = vpop.xlane.xlu0 %937 }
 0x23b   :  { %v964_v34 = vmul.f32 0.6931472, %v1405_v33  ;;  %v936_v36 = vpop.xlane.xlu1 %935 }
 0x23c   :  { %v1027_v41 = vsub.f32 %v1838_v11, %v966_v60  ;;  %1414 = vlog2.f32 %v936_v36 }
 0x23d   :  { %v1026_v40 = vsub.f32 %v1841_v1, %v964_v34  ;;  %1416 = vlog2.f32 %v938_v48 }
 0x23e   :  { %v1407_v43 = vpop.eup %1406  ;;  %1059 = vst [vmem:[%s2085_s3 + $0x10] sm:$0xff] %v1027_v41 }
 0x23f   :  { %v1409_v2 = vpop.eup %1408  ;;  %1058 = vst [vmem:[%s2085_s3 + $0x8] sm:$0xff] %v1026_v40  ;;  %v996_v44 = vmul.f32 0.6931472, %v1407_v43  ;;  %v908_v55 = vpop.xlane.xlu1 %907 }
 0x240   :  { %v910_v51 = vpop.xlane.xlu0 %909  ;;  %v998_v53 = vmul.f32 0.6931472, %v1409_v2  ;;  %1418 = vlog2.f32 %v908_v55 }
 0x241   :  { %v1042_v11 = vsub.f32 %v1835_v10, %v996_v44  ;;  %1420 = vlog2.f32 %v910_v51 }
 0x242   :  { %v1411_v1 = vpop.eup %1410  ;;  %v1043_v52 = vsub.f32 %v1850_v4, %v998_v53 }
 0x243   :  { %v1413_v54 = vpop.eup %1412  ;;  %1074 = vst [vmem:[%s2085_s3 + $0x88] sm:$0xff] %v1042_v11  ;;  %v968_v61 = vmul.f32 0.6931472, %v1411_v1  ;;  %v940_v62 = vpop.xlane.xlu1 %939 }
 0x244   :  { %v942_v0 = vpop.xlane.xlu0 %941  ;;  %1075 = vst [vmem:[%s2085_s3 + $0x90] sm:$0xff] %v1043_v52  ;;  %v970_v59 = vmul.f32 0.6931472, %v1413_v54  ;;  %1422 = vlog2.f32 %v940_v62 }
 0x245   :  { %v1028_v10 = vsub.f32 %v1847_v18, %v968_v61  ;;  %1424 = vlog2.f32 %v942_v0 }
 0x246   :  { %v1415_v58 = vpop.eup %1414  ;;  %v1029_v4 = vsub.f32 %v1858_v32, %v970_v59 }
 0x247   :  { %v1417_v3 = vpop.eup %1416  ;;  %1060 = vst [vmem:[%s2085_s3 + $0x18] sm:$0xff] %v1028_v10  ;;  %v1000_v8 = vmul.f32 0.6931472, %v1415_v58  ;;  %v912_v12 = vpop.xlane.xlu1 %911 }
 0x248   :  { %v914_v13 = vpop.xlane.xlu0 %913  ;;  %1061 = vst [vmem:[%s2085_s3 + $0x20] sm:$0xff] %v1029_v4  ;;  %v1002_v5 = vmul.f32 0.6931472, %v1417_v3  ;;  %1426 = vlog2.f32 %v912_v12 }
 0x249   :  { %v1044_v18 = vsub.f32 %v1855_v29, %v1000_v8  ;;  %1428 = vlog2.f32 %v914_v13 }
 0x24a   :  { %v1419_v15 = vpop.eup %1418  ;;  %v1045_v32 = vsub.f32 %v1866_v39, %v1002_v5 }
 0x24b   :  { %v1421_v17 = vpop.eup %1420  ;;  %1076 = vst [vmem:[%s2085_s3 + $0x98] sm:$0xff] %v1044_v18  ;;  %v972_v20 = vmul.f32 0.6931472, %v1419_v15  ;;  %v944_v21 = vpop.xlane.xlu1 %943 }
 0x24c   :  { %v946_v19 = vpop.xlane.xlu0 %945  ;;  %1077 = vst [vmem:[%s2085_s3 + $0xa0] sm:$0xff] %v1045_v32  ;;  %v974_v27 = vmul.f32 0.6931472, %v1421_v17  ;;  %1430 = vlog2.f32 %v944_v21 }
 0x24d   :  { %v1030_v29 = vsub.f32 %v1863_v37, %v972_v20  ;;  %1432 = vlog2.f32 %v946_v19 }
 0x24e   :  { %v1423_v23 = vpop.eup %1422  ;;  %v1031_v39 = vsub.f32 %v1874_v45, %v974_v27 }
 0x24f   :  { %v1425_v25 = vpop.eup %1424  ;;  %1062 = vst [vmem:[%s2085_s3 + $0x28] sm:$0xff] %v1030_v29  ;;  %v1004_v26 = vmul.f32 0.6931472, %v1423_v23  ;;  %v916_v33 = vpop.xlane.xlu1 %915 }
 0x250   :  { %v918_v60 = vpop.xlane.xlu0 %917  ;;  %1063 = vst [vmem:[%s2085_s3 + $0x30] sm:$0xff] %v1031_v39  ;;  %v1006_v34 = vmul.f32 0.6931472, %v1425_v25  ;;  %1434 = vlog2.f32 %v916_v33 }
 0x251   :  { %v1046_v37 = vsub.f32 %v1871_v50, %v1004_v26  ;;  %1436 = vlog2.f32 %v918_v60 }
 0x252   :  { %v1427_v36 = vpop.eup %1426  ;;  %v1047_v45 = vsub.f32 %v1882_v57, %v1006_v34 }
 0x253   :  { %v1429_v48 = vpop.eup %1428  ;;  %1078 = vst [vmem:[%s2085_s3 + $0xa8] sm:$0xff] %v1046_v37  ;;  %v976_v41 = vmul.f32 0.6931472, %v1427_v36  ;;  %v948_v40 = vpop.xlane.xlu1 %947 }
 0x254   :  { %v950_v43 = vpop.xlane.xlu0 %949  ;;  %1079 = vst [vmem:[%s2085_s3 + $0xb0] sm:$0xff] %v1047_v45  ;;  %v978_v2 = vmul.f32 0.6931472, %v1429_v48  ;;  %1438 = vlog2.f32 %v948_v40 }
 0x255   :  { %v1032_v50 = vsub.f32 %v1879_v49, %v976_v41  ;;  %1440 = vlog2.f32 %v950_v43 }
 0x256   :  { %v1431_v44 = vpop.eup %1430  ;;  %v1033_v57 = vsub.f32 %v1890_v6, %v978_v2 }
 0x257   :  { %v1433_v55 = vpop.eup %1432  ;;  %1064 = vst [vmem:[%s2085_s3 + $0x38] sm:$0xff] %v1032_v50  ;;  %v1008_v51 = vmul.f32 0.6931472, %v1431_v44  ;;  %v920_v53 = vpop.xlane.xlu1 %919 }
 0x258   :  { %v922_v11 = vpop.xlane.xlu0 %921  ;;  %1065 = vst [vmem:[%s2085_s3 + $0x40] sm:$0xff] %v1033_v57  ;;  %v1010_v1 = vmul.f32 0.6931472, %v1433_v55  ;;  %1442 = vlog2.f32 %v920_v53 }
 0x259   :  { %v1048_v49 = vsub.f32 %v1887_v14, %v1008_v51  ;;  %1444 = vlog2.f32 %v922_v11 }
 0x25a   :  { %v1435_v52 = vpop.eup %1434  ;;  %v1049_v6 = vsub.f32 %v1898_v16, %v1010_v1 }
 0x25b   :  { %v1437_v54 = vpop.eup %1436  ;;  %1080 = vst [vmem:[%s2085_s3 + $0xb8] sm:$0xff] %v1048_v49  ;;  %v980_v61 = vmul.f32 0.6931472, %v1435_v52  ;;  %v952_v62 = vpop.xlane.xlu1 %951 }
 0x25c   :  { %v954_v0 = vpop.xlane.xlu0 %953  ;;  %1081 = vst [vmem:[%s2085_s3 + $0xc0] sm:$0xff] %v1049_v6  ;;  %v982_v59 = vmul.f32 0.6931472, %v1437_v54  ;;  %1446 = vlog2.f32 %v952_v62 }
 0x25d   :  { %v1034_v14 = vsub.f32 %v1895_v28, %v980_v61  ;;  %1448 = vlog2.f32 %v954_v0 }
 0x25e   :  { %v1439_v10 = vpop.eup %1438  ;;  %v1035_v16 = vsub.f32 %v1906_v30, %v982_v59 }
 0x25f   :  { %v1441_v58 = vpop.eup %1440  ;;  %1066 = vst [vmem:[%s2085_s3 + $0x48] sm:$0xff] %v1034_v14  ;;  %v1012_v4 = vmul.f32 0.6931472, %v1439_v10  ;;  %v924_v3 = vpop.xlane.xlu1 %923 }
 0x260   :  { %v926_v8 = vpop.xlane.xlu0 %925  ;;  %1067 = vst [vmem:[%s2085_s3 + $0x50] sm:$0xff] %v1035_v16  ;;  %v1014_v12 = vmul.f32 0.6931472, %v1441_v58  ;;  %1450 = vlog2.f32 %v924_v3 }
 0x261   :  { %v1050_v28 = vsub.f32 %v1903_v35, %v1012_v4  ;;  %1452 = vlog2.f32 %v926_v8 }
 0x262   :  { %v1443_v13 = vpop.eup %1442  ;;  %v1051_v30 = vsub.f32 %v1914_v42, %v1014_v12 }
 0x263   :  { %v1445_v5 = vpop.eup %1444  ;;  %1082 = vst [vmem:[%s2085_s3 + $0xc8] sm:$0xff] %v1050_v28  ;;  %v984_v18 = vmul.f32 0.6931472, %v1443_v13  ;;  %v956_v15 = vpop.xlane.xlu1 %955 }
 0x264   :  { %v958_v32 = vpop.xlane.xlu0 %957  ;;  %1083 = vst [vmem:[%s2085_s3 + $0xd0] sm:$0xff] %v1051_v30  ;;  %v986_v17 = vmul.f32 0.6931472, %v1445_v5  ;;  %1454 = vlog2.f32 %v956_v15 }
 0x265   :  { %v1036_v35 = vsub.f32 %v1911_v46, %v984_v18  ;;  %1456 = vlog2.f32 %v958_v32 }
 0x266   :  { %v1447_v20 = vpop.eup %1446  ;;  %v1037_v42 = vsub.f32 %v1922_v56, %v986_v17 }
 0x267   :  { %v1449_v21 = vpop.eup %1448  ;;  %1068 = vst [vmem:[%s2085_s3 + $0x58] sm:$0xff] %v1036_v35  ;;  %v1016_v19 = vmul.f32 0.6931472, %v1447_v20  ;;  %v928_v27 = vpop.xlane.xlu1 %927 }
 0x268   :  { %1069 = vst [vmem:[%s2085_s3 + $0x60] sm:$0xff] %v1037_v42  ;;  %v1018_v29 = vmul.f32 0.6931472, %v1449_v21  ;;  %1458 = vlog2.f32 %v928_v27 }
 0x269   :  { %v1052_v23 = vsub.f32 %v1919_v63, %v1016_v19 }
 0x26a   :  { %v1451_v46 = vpop.eup %1450  ;;  %v1053_v39 = vsub.f32 %v1930_v9, %v1018_v29 }
 0x26b   :  { %v1453_v25 = vpop.eup %1452  ;;  %1084 = vst [vmem:[%s2085_s3 + $0xd8] sm:$0xff] %v1052_v23  ;;  %v988_v56 = vmul.f32 0.6931472, %v1451_v46  ;;  %v960_v26 = vpop.xlane.xlu1 %959 }
 0x26c   :  { %1085 = vst [vmem:[%s2085_s3 + $0xe0] sm:$0xff] %v1053_v39  ;;  %v990_v33 = vmul.f32 0.6931472, %v1453_v25  ;;  %1460 = vlog2.f32 %v960_v26 }
 0x26d   :  { %v1038_v60 = vsub.f32 %v1927_v7, %v988_v56 }
 0x26e   :  { %v1455_v34 = vpop.eup %1454  ;;  %v1039_v63 = vsub.f32 %v1938_v22, %v990_v33 }
 0x26f   :  { %v1457_v37 = vpop.eup %1456  ;;  %1070 = vst [vmem:[%s2085_s3 + $0x68] sm:$0xff] %v1038_v60  ;;  %v1020_v9 = vmul.f32 0.6931472, %v1455_v34 }
 0x270   :  { %1071 = vst [vmem:[%s2085_s3 + $0x70] sm:$0xff] %v1039_v63  ;;  %v1022_v36 = vmul.f32 0.6931472, %v1457_v37 }
 0x271   :  { %v1054_v45 = vsub.f32 %v1935_v24, %v1020_v9 }
 0x272   :  { %v1459_v48 = vpop.eup %1458  ;;  %v1055_v41 = vsub.f32 %v1943_v38, %v1022_v36 }
 0x273   :  { %1086 = vst [vmem:[%s2085_s3 + $0xe8] sm:$0xff] %v1054_v45  ;;  %v992_v7 = vmul.f32 0.6931472, %v1459_v48 }
 0x274   :  { %1087 = vst [vmem:[%s2085_s3 + $0xf0] sm:$0xff] %v1055_v41 }
 0x275   :  { %v1040_v22 = vsub.f32 %v1946_v31, %v992_v7 }
 0x276   :  { %v1461_v40 = vpop.eup %1460 }
 0x277   :  { %1072 = vst [vmem:[%s2085_s3 + $0x78] sm:$0xff] %v1040_v22  ;;  %v1024_v24 = vmul.f32 0.6931472, %v1461_v40 }
 0x279   :  { %v1056_v43 = vsub.f32 %v1951_v47, %v1024_v24 }
 0x27b   :  { %1088 = vst [vmem:[%s2085_s3 + $0xf8] sm:$0xff] %v1056_v43 }

// kernel: gcn_layer_forward.2
= control target key start
LH: loop header
LB: loop body
LE: loop exit
PB: predicated region body
PF: predicated region fallthrough
CT: control target
= control target key end

     0   :  { %s1920_s1 = inlined_call_operand.vmem [shape: bf16[256,128], index: 1, kind: input, shape index: {}]   ;;  %s1921_s0 = inlined_call_operand.vmem [shape: bf16[256,256], index: 0, kind: input, shape index: {}]   ;;  %s1922_s3 = inlined_call_operand.vmem [shape: bf16[128,128], index: 3, kind: input, shape index: {}]   ;;  %s1923_s2 = inlined_call_operand.vmem [shape: f32[1,128], index: 2, kind: input, shape index: {}]   ;;  %s1924_s4 = inlined_call_operand.vmem [shape: bf16[256,128], index: 4, kind: output, shape index: {}]  }
   0x1   :  { %v1558_v0 = vld [vmem:[%s1920_s1 + $0x40] sm:$0xff]   ;;  %v1560_v2 = vld [vmem:[%s1920_s1 + $0x48] sm:$0xff]   ;;  %v1562_v4 = vld [vmem:[%s1920_s1 + $0x50] sm:$0xff]  }
   0x2   :  { %v1559_v1 = vld [vmem:[%s1920_s1] sm:$0xff]   ;;  %1358 = vmatprep.subr.bf16.mxu0 %v1558_v0  ;;  %1542 = vmatprep.subr.bf16.mxu1 %v1558_v0  ;;  %v1561_v3 = vld [vmem:[%s1920_s1 + $0x8] sm:$0xff]   ;;  %v1563_v5 = vld [vmem:[%s1920_s1 + $0x10] sm:$0xff]  }
   0x3   :  { %1359 = vmatpush3.bf16.msra.mxu0 %v1559_v1  ;;  %1550 = vmatpush3.bf16.msra.mxu1 %v1559_v1  ;;  %v1564_v6 = vld [vmem:[%s1920_s1 + $0x58] sm:$0xff]   ;;  %v1566_v8 = vld [vmem:[%s1920_s1 + $0x60] sm:$0xff]   ;;  %v1568_v10 = vld [vmem:[%s1920_s1 + $0x68] sm:$0xff]  }
   0x4   :  { %1360 = vmatprep.subr.bf16.mxu0 %v1560_v2  ;;  %1543 = vmatprep.subr.bf16.mxu1 %v1560_v2  ;;  %v1565_v7 = vld [vmem:[%s1920_s1 + $0x18] sm:$0xff]   ;;  %v1567_v9 = vld [vmem:[%s1920_s1 + $0x20] sm:$0xff]   ;;  %v1569_v12 = vld [vmem:[%s1920_s1 + $0x28] sm:$0xff]  }
   0x5   :  { %v1576_v11 = vld [vmem:[%s1921_s0 + $0x4] ss:$8 sps:$4 sm:$0xff]   ;;  %v1570_v13 = vld [vmem:[%s1920_s1 + $0x70] sm:$0xff]   ;;  %v1572_v15 = vld [vmem:[%s1920_s1 + $0x78] sm:$0xff]  }
   0x6   :  { %438 = vmatprep.mubr.bf16.mxu0 %v1576_v11  ;;  %v1571_v14 = vld [vmem:[%s1920_s1 + $0x30] sm:$0xff]   ;;  %v1573_v16 = vld [vmem:[%s1920_s1 + $0x38] sm:$0xff]   ;;  %v1574_v17 = vld [vmem:[%s1921_s0] ss:$8 sps:$4 sm:$0xff]  }
   0x7   :  { %1361 = vmatpush3.bf16.msra.mxu0 %v1561_v3  ;;  %1551 = vmatpush3.bf16.msra.mxu1 %v1561_v3  ;;  %v1606_v18 = vld [vmem:[%s1921_s0 + $0xc4] ss:$8 sps:$4 sm:$0xff]   ;;  %v1577_v19 = vld [vmem:[%s1921_s0 + $0x14] ss:$8 sps:$4 sm:$0xff]   ;;  %v1604_v20 = vld [vmem:[%s1921_s0 + $0xc0] ss:$8 sps:$4 sm:$0xff]  }
   0x8   :  { %1362 = vmatprep.subr.bf16.mxu0 %v1562_v4  ;;  %1544 = vmatprep.subr.bf16.mxu1 %v1562_v4  ;;  %v1610_v21 = vld [vmem:[%s1921_s0 + $0xd4] ss:$8 sps:$4 sm:$0xff]   ;;  %v1579_v22 = vld [vmem:[%s1921_s0 + $0x10] ss:$8 sps:$4 sm:$0xff]   ;;  %v1580_v23 = vld [vmem:[%s1921_s0 + $0x24] ss:$8 sps:$4 sm:$0xff]  }
   0x9   :  { %534 = vmatprep.mubr.bf16.mxu1 %v1606_v18  ;;  %v1612_v24 = vld [vmem:[%s1921_s0 + $0xd0] ss:$8 sps:$4 sm:$0xff]   ;;  %v1616_v25 = vld [vmem:[%s1921_s0 + $0xe4] ss:$8 sps:$4 sm:$0xff]   ;;  %v1582_v29 = vld [vmem:[%s1921_s0 + $0x20] ss:$8 sps:$4 sm:$0xff]  }
   0xa   :  { %v1622_v26 = vld [vmem:[%s1922_s3] sm:$0xff]   ;;  %v1623_v27 = vld [vmem:[%s1922_s3 + $0x8] sm:$0xff]   ;;  %v1624_v28 = vld [vmem:[%s1922_s3 + $0x10] sm:$0xff]  }
   0xb   :  { %1363 = vmatpush3.bf16.msra.mxu0 %v1563_v5  ;;  %1552 = vmatpush3.bf16.msra.mxu1 %v1563_v5  ;;  %v1583_v30 = vld [vmem:[%s1921_s0 + $0x34] ss:$8 sps:$4 sm:$0xff]   ;;  %v1618_v31 = vld [vmem:[%s1921_s0 + $0xe0] ss:$8 sps:$4 sm:$0xff]   ;;  %v1585_v33 = vld [vmem:[%s1921_s0 + $0x30] ss:$8 sps:$4 sm:$0xff]  }
   0xc   :  { %1364 = vmatprep.subr.bf16.mxu0 %v1564_v6  ;;  %1545 = vmatprep.subr.bf16.mxu1 %v1564_v6  ;;  %v1619_v32 = vld [vmem:[%s1921_s0 + $0xf4] ss:$8 sps:$4 sm:$0xff]   ;;  %v1586_v34 = vld [vmem:[%s1921_s0 + $0x44] ss:$8 sps:$4 sm:$0xff]   ;;  %v1621_v35 = vld [vmem:[%s1921_s0 + $0xf0] ss:$8 sps:$4 sm:$0xff]  }
   0xd   :  { %v1588_v36 = vld [vmem:[%s1921_s0 + $0x40] ss:$8 sps:$4 sm:$0xff]   ;;  %v1589_v37 = vld [vmem:[%s1921_s0 + $0x54] ss:$8 sps:$4 sm:$0xff]   ;;  %v1591_v38 = vld [vmem:[%s1921_s0 + $0x50] ss:$8 sps:$4 sm:$0xff]  }
   0xe   :  { %v1592_v39 = vld [vmem:[%s1921_s0 + $0x64] ss:$8 sps:$4 sm:$0xff]   ;;  %v1594_v40 = vld [vmem:[%s1921_s0 + $0x60] ss:$8 sps:$4 sm:$0xff]   ;;  %v1595_v41 = vld [vmem:[%s1921_s0 + $0x74] ss:$8 sps:$4 sm:$0xff]  }
   0xf   :  { %1365 = vmatpush3.bf16.msra.mxu0 %v1565_v7  ;;  %1553 = vmatpush3.bf16.msra.mxu1 %v1565_v7  ;;  %v1597_v42 = vld [vmem:[%s1921_s0 + $0x70] ss:$8 sps:$4 sm:$0xff]   ;;  %v1598_v43 = vld [vmem:[%s1921_s0 + $0x84] ss:$8 sps:$4 sm:$0xff]   ;;  %v1600_v44 = vld [vmem:[%s1921_s0 + $0x80] ss:$8 sps:$4 sm:$0xff]  }
  0x10   :  { %1366 = vmatprep.subr.bf16.mxu0 %v1566_v8  ;;  %1546 = vmatprep.subr.bf16.mxu1 %v1566_v8  ;;  %v1601_v45 = vld [vmem:[%s1921_s0 + $0x94] ss:$8 sps:$4 sm:$0xff]   ;;  %v1603_v46 = vld [vmem:[%s1921_s0 + $0x90] ss:$8 sps:$4 sm:$0xff]   ;;  %v1607_v47 = vld [vmem:[%s1921_s0 + $0xa4] ss:$8 sps:$4 sm:$0xff]  }
  0x11   :  { %v1609_v48 = vld [vmem:[%s1921_s0 + $0xa0] ss:$8 sps:$4 sm:$0xff]   ;;  %v1613_v49 = vld [vmem:[%s1921_s0 + $0xb4] ss:$8 sps:$4 sm:$0xff]   ;;  %v1615_v51 = vld [vmem:[%s1921_s0 + $0xb0] ss:$8 sps:$4 sm:$0xff]  }
  0x12   :  { %v1625_v50 = vld [vmem:[%s1922_s3 + $0x18] sm:$0xff]   ;;  %v1626_v52 = vld [vmem:[%s1922_s3 + $0x20] sm:$0xff]   ;;  %v1627_v53 = vld [vmem:[%s1922_s3 + $0x28] sm:$0xff]  }
  0x13   :  { %1367 = vmatpush3.bf16.msra.mxu0 %v1567_v9  ;;  %1554 = vmatpush3.bf16.msra.mxu1 %v1567_v9  ;;  %v1628_v54 = vld [vmem:[%s1922_s3 + $0x30] sm:$0xff]   ;;  %v1629_v55 = vld [vmem:[%s1922_s3 + $0x38] sm:$0xff]   ;;  %v1826_v58 = vld [vmem:[%s1923_s2] ss:$0 sm:$0xff] }
  0x14   :  { %1368 = vmatprep.subr.bf16.mxu0 %v1568_v10  ;;  %1547 = vmatprep.subr.bf16.mxu1 %v1568_v10 }
  0x17   :  { %1369 = vmatpush3.bf16.msra.mxu0 %v1569_v12  ;;  %1555 = vmatpush3.bf16.msra.mxu1 %v1569_v12 }
  0x18   :  { %1370 = vmatprep.subr.bf16.mxu0 %v1570_v13  ;;  %1548 = vmatprep.subr.bf16.mxu1 %v1570_v13 }
  0x1b   :  { %1371 = vmatpush3.bf16.msra.mxu0 %v1571_v14  ;;  %1556 = vmatpush3.bf16.msra.mxu1 %v1571_v14 }
  0x1c   :  { %1372 = vmatprep.subr.bf16.mxu0 %v1572_v15  ;;  %1549 = vmatprep.subr.bf16.mxu1 %v1572_v15 }
  0x1f   :  { %1373 = vmatpush3.bf16.msra.mxu0 %v1573_v16  ;;  %1557 = vmatpush3.bf16.msra.mxu1 %v1573_v16 }
  0x20   :  { %1494 = vmatprep.subr.bf16.mxu1 %v1622_v26 }
  0x22   :  { %439 = vmatmul.mubr.bf16.vlgmr.msra.gmra.mrb[0].mxu0 %v1574_v17  ;;  %535 = vmatmul.mubr.bf16.vlgmr.msra.gmra.mrb[0].mxu1 %v1604_v20 }
  0x23   :  { %446 = vmatprep.mubr.bf16.mxu0 %v1577_v19  ;;  %542 = vmatprep.mubr.bf16.mxu1 %v1610_v21 }
  0x24   :  { %1495 = vmatpush3.bf16.msra.mxu1 %v1622_v26 }
  0x25   :  { %1496 = vmatprep.subr.bf16.mxu1 %v1623_v27 }
  0x28   :  { %1497 = vmatpush3.bf16.msra.mxu1 %v1623_v27 }
  0x29   :  { %1498 = vmatprep.subr.bf16.mxu1 %v1624_v28 }
  0x2a   :  { %447 = vmatmul.mubr.bf16.gmra.mrb[4].mxu0 %v1579_v22  ;;  %543 = vmatmul.mubr.bf16.gmra.mrb[4].mxu1 %v1612_v24 }
  0x2b   :  { %454 = vmatprep.mubr.bf16.mxu0 %v1580_v23  ;;  %550 = vmatprep.mubr.bf16.mxu1 %v1616_v25 }
  0x2c   :  { %1499 = vmatpush3.bf16.msra.mxu1 %v1624_v28 }
  0x2d   :  { %1500 = vmatprep.subr.bf16.mxu1 %v1625_v50 }
  0x30   :  { %1501 = vmatpush3.bf16.msra.mxu1 %v1625_v50 }
  0x31   :  { %1502 = vmatprep.subr.bf16.mxu1 %v1626_v52 }
  0x32   :  { %455 = vmatmul.mubr.bf16.gmra.mrb[8].mxu0 %v1582_v29  ;;  %551 = vmatmul.mubr.bf16.gmra.mrb[8].mxu1 %v1618_v31 }
  0x33   :  { %462 = vmatprep.mubr.bf16.mxu0 %v1583_v30  ;;  %558 = vmatprep.mubr.bf16.mxu1 %v1619_v32 }
  0x34   :  { %1503 = vmatpush3.bf16.msra.mxu1 %v1626_v52 }
  0x35   :  { %1504 = vmatprep.subr.bf16.mxu1 %v1627_v53 }
  0x38   :  { %1505 = vmatpush3.bf16.msra.mxu1 %v1627_v53 }
  0x39   :  { %1506 = vmatprep.subr.bf16.mxu1 %v1628_v54 }
  0x3a   :  { %463 = vmatmul.mubr.bf16.gmra.mrb[12].mxu0 %v1585_v33  ;;  %559 = vmatmul.mubr.bf16.gmra.mrb[12].mxu1 %v1621_v35 }
  0x3b   :  { %470 = vmatprep.mubr.bf16.mxu0 %v1586_v34 }
  0x3c   :  { %1507 = vmatpush3.bf16.msra.mxu1 %v1628_v54 }
  0x3d   :  { %1508 = vmatprep.subr.bf16.mxu1 %v1629_v55 }
  0x40   :  { %1509 = vmatpush3.bf16.msra.mxu1 %v1629_v55 }
  0x42   :  { %471 = vmatmul.mubr.bf16.gmra.mrb[16].mxu0 %v1588_v36 }
  0x43   :  { %478 = vmatprep.mubr.bf16.mxu0 %v1589_v37 }
  0x4a   :  { %479 = vmatmul.mubr.bf16.gmra.mrb[20].mxu0 %v1591_v38 }
  0x4b   :  { %486 = vmatprep.mubr.bf16.mxu0 %v1592_v39 }
  0x52   :  { %487 = vmatmul.mubr.bf16.gmra.mrb[24].mxu0 %v1594_v40 }
  0x53   :  { %494 = vmatprep.mubr.bf16.mxu0 %v1595_v41 }
  0x5a   :  { %495 = vmatmul.mubr.bf16.gmra.mrb[28].mxu0 %v1597_v42 }
  0x5b   :  { %502 = vmatprep.mubr.bf16.mxu0 %v1598_v43 }
  0x62   :  { %503 = vmatmul.mubr.bf16.gmra.mrb[32].mxu0 %v1600_v44 }
  0x63   :  { %510 = vmatprep.mubr.bf16.mxu0 %v1601_v45 }
  0x6a   :  { %511 = vmatmul.mubr.bf16.gmra.mrb[36].mxu0 %v1603_v46 }
  0x6b   :  { %518 = vmatprep.mubr.bf16.mxu0 %v1607_v47 }
  0x72   :  { %519 = vmatmul.mubr.bf16.gmra.mrb[40].mxu0 %v1609_v48 }
  0x73   :  { %526 = vmatprep.mubr.bf16.mxu0 %v1613_v49 }
  0x7a   :  { %527 = vmatmul.mubr.bf16.gmra.mrb[44].mxu0 %v1615_v51 }
  0xf5   :  { %v1374_v56 = vpop.f32.mrb[0].mxu0  ;;  %v1446_v59 = vpop.f32.mrb[0].mxu1 }
  0xf6   :  { %v1375_v57 = vpop.f32.mrb[1].mxu0  ;;  %v1447_v62 = vpop.f32.mrb[1].mxu1 }
  0xf7   :  { %v1376_v60 = vadd.f32 %v1375_v57, %v1374_v56  ;;  %v1377_v61 = vpop.f32.mrb[2].mxu0  ;;  %v1448_v0 = vadd.f32 %v1447_v62, %v1446_v59  ;;  %v1449_v1 = vpop.f32.mrb[2].mxu1 }
  0xf8   :  { %v1378_v63 = vpop.f32.mrb[3].mxu0  ;;  %v1450_v4 = vpop.f32.mrb[3].mxu1 }
  0xf9   :  { %v673_v2 = vadd.f32 %v1376_v60, %v1826_v58  ;;  %v1379_v3 = vadd.f32 %v1378_v63, %v1377_v61  ;;  %v697_v5 = vadd.f32 %v1448_v0, %v1826_v58  ;;  %v1451_v6 = vadd.f32 %v1450_v4, %v1449_v1 }
  0xfb   :  { %v674_v7 = vadd.f32 %v1379_v3, %v1826_v58  ;;  %v729_v8 = vmax.f32 %v697_v5, 0.0  ;;  %v698_v9 = vadd.f32 %v1451_v6, %v1826_v58  ;;  %v705_v10 = vmax.f32 %v673_v2, 0.0 }
  0xfd   :  { %v706_v11 = vmax.f32 %v674_v7, 0.0  ;;  %v1380_v12 = vpop.f32.mrb[4].mxu0  ;;  %v730_v14 = vmax.f32 %v698_v9, 0.0  ;;  %v1452_v15 = vpop.f32.mrb[4].mxu1 }
  0xfe   :  { %v1381_v13 = vpop.f32.mrb[5].mxu0  ;;  %v1453_v19 = vpop.f32.mrb[5].mxu1 }
  0xff   :  { %v1382_v16 = vadd.f32 %v1381_v13, %v1380_v12  ;;  %v1383_v17 = vpop.f32.mrb[6].mxu0  ;;  %v737_v18 = vpack.c.bf16 %v706_v11, %v705_v10  ;;  %v1454_v21 = vadd.f32 %v1453_v19, %v1452_v15  ;;  %v1455_v22 = vpop.f32.mrb[6].mxu1  ;;  %v1832_v23 = vpack.c.bf16 %v730_v14, %v729_v8 }
 0x100   :  { %v1384_v20 = vpop.f32.mrb[7].mxu0  ;;  %v1456_v26 = vpop.f32.mrb[7].mxu1 }
 0x101   :  { %v675_v24 = vadd.f32 %v1382_v16, %v1826_v58  ;;  %v1385_v25 = vadd.f32 %v1384_v20, %v1383_v17  ;;  %1510 = vmatprep.mubr.bf16.mxu1 %v737_v18  ;;  %v699_v27 = vadd.f32 %v1454_v21, %v1826_v58  ;;  %v1457_v28 = vadd.f32 %v1456_v26, %v1455_v22 }
 0x103   :  { %v676_v29 = vadd.f32 %v1385_v25, %v1826_v58  ;;  %v731_v30 = vmax.f32 %v699_v27, 0.0  ;;  %v700_v31 = vadd.f32 %v1457_v28, %v1826_v58  ;;  %v707_v32 = vmax.f32 %v675_v24, 0.0 }
 0x105   :  { %v708_v33 = vmax.f32 %v676_v29, 0.0  ;;  %v1386_v34 = vpop.f32.mrb[8].mxu0  ;;  %v732_v36 = vmax.f32 %v700_v31, 0.0  ;;  %v1458_v37 = vpop.f32.mrb[8].mxu1 }
 0x106   :  { %v1387_v35 = vpop.f32.mrb[9].mxu0  ;;  %v1459_v41 = vpop.f32.mrb[9].mxu1 }
 0x107   :  { %v738_v38 = vpack.c.bf16 %v708_v33, %v707_v32  ;;  %v1388_v39 = vadd.f32 %v1387_v35, %v1386_v34  ;;  %v1389_v40 = vpop.f32.mrb[10].mxu0  ;;  %v1460_v43 = vadd.f32 %v1459_v41, %v1458_v37  ;;  %v1461_v44 = vpop.f32.mrb[10].mxu1  ;;  %v1838_v45 = vpack.c.bf16 %v732_v36, %v731_v30 }
 0x108   :  { %v1390_v42 = vpop.f32.mrb[11].mxu0  ;;  %v1462_v48 = vpop.f32.mrb[11].mxu1 }
 0x109   :  { %v677_v46 = vadd.f32 %v1388_v39, %v1826_v58  ;;  %v1391_v47 = vadd.f32 %v1390_v42, %v1389_v40  ;;  %1511 = vmatmul.mubr.bf16.vlgmr.msra.gmra.mrb[16].mxu1 %v738_v38  ;;  %v701_v49 = vadd.f32 %v1460_v43, %v1826_v58  ;;  %v1463_v50 = vadd.f32 %v1462_v48, %v1461_v44 }
 0x10b   :  { %v678_v51 = vadd.f32 %v1391_v47, %v1826_v58  ;;  %v733_v52 = vmax.f32 %v701_v49, 0.0  ;;  %v702_v53 = vadd.f32 %v1463_v50, %v1826_v58  ;;  %v709_v54 = vmax.f32 %v677_v46, 0.0 }
 0x10d   :  { %v710_v55 = vmax.f32 %v678_v51, 0.0  ;;  %v1392_v56 = vpop.f32.mrb[12].mxu0  ;;  %v734_v59 = vmax.f32 %v702_v53, 0.0  ;;  %v1464_v60 = vpop.f32.mrb[12].mxu1 }
 0x10e   :  { %v1393_v57 = vpop.f32.mrb[13].mxu0  ;;  %v1465_v0 = vpop.f32.mrb[13].mxu1 }
 0x10f   :  { %v1394_v61 = vadd.f32 %v1393_v57, %v1392_v56  ;;  %v1395_v62 = vpop.f32.mrb[14].mxu0  ;;  %v739_v63 = vpack.c.bf16 %v710_v55, %v709_v54  ;;  %v1466_v2 = vadd.f32 %v1465_v0, %v1464_v60  ;;  %v1467_v3 = vpop.f32.mrb[14].mxu1  ;;  %v1844_v4 = vpack.c.bf16 %v734_v59, %v733_v52 }
 0x110   :  { %v1396_v1 = vpop.f32.mrb[15].mxu0  ;;  %v1468_v7 = vpop.f32.mrb[15].mxu1 }
 0x111   :  { %v679_v5 = vadd.f32 %v1394_v61, %v1826_v58  ;;  %v1397_v6 = vadd.f32 %v1396_v1, %v1395_v62  ;;  %1514 = vmatprep.mubr.bf16.mxu1 %v739_v63  ;;  %v703_v8 = vadd.f32 %v1466_v2, %v1826_v58  ;;  %v1469_v9 = vadd.f32 %v1468_v7, %v1467_v3 }
 0x113   :  { %v680_v10 = vadd.f32 %v1397_v6, %v1826_v58  ;;  %v735_v11 = vmax.f32 %v703_v8, 0.0  ;;  %v704_v12 = vadd.f32 %v1469_v9, %v1826_v58  ;;  %v711_v13 = vmax.f32 %v679_v5, 0.0 }
 0x115   :  { %v712_v14 = vmax.f32 %v680_v10, 0.0  ;;  %v1398_v15 = vpop.f32.mrb[16].mxu0  ;;  %v736_v17 = vmax.f32 %v704_v12, 0.0 }
 0x116   :  { %v1399_v16 = vpop.f32.mrb[17].mxu0 }
 0x117   :  { %v1400_v18 = vadd.f32 %v1399_v16, %v1398_v15  ;;  %v1401_v19 = vpop.f32.mrb[18].mxu0  ;;  %v740_v20 = vpack.c.bf16 %v712_v14, %v711_v13  ;;  %v1850_v22 = vpack.c.bf16 %v736_v17, %v735_v11 }
 0x118   :  { %v1402_v21 = vpop.f32.mrb[19].mxu0 }
 0x119   :  { %v681_v24 = vadd.f32 %v1400_v18, %v1826_v58  ;;  %v1403_v25 = vadd.f32 %v1402_v21, %v1401_v19  ;;  %1515 = vmatmul.mubr.bf16.gmra.mrb[20].mxu1 %v740_v20 }
 0x11b   :  { %v682_v26 = vadd.f32 %v1403_v25, %v1826_v58  ;;  %v713_v27 = vmax.f32 %v681_v24, 0.0 }
 0x11d   :  { %v714_v28 = vmax.f32 %v682_v26, 0.0  ;;  %v1404_v29 = vpop.f32.mrb[20].mxu0 }
 0x11e   :  { %v1405_v30 = vpop.f32.mrb[21].mxu0 }
 0x11f   :  { %v1406_v31 = vadd.f32 %v1405_v30, %v1404_v29  ;;  %v1407_v32 = vpop.f32.mrb[22].mxu0  ;;  %v741_v33 = vpack.c.bf16 %v714_v28, %v713_v27 }
 0x120   :  { %v1408_v34 = vpop.f32.mrb[23].mxu0 }
 0x121   :  { %v683_v35 = vadd.f32 %v1406_v31, %v1826_v58  ;;  %v1409_v36 = vadd.f32 %v1408_v34, %v1407_v32  ;;  %1518 = vmatprep.mubr.bf16.mxu1 %v741_v33 }
 0x123   :  { %v684_v37 = vadd.f32 %v1409_v36, %v1826_v58  ;;  %v715_v38 = vmax.f32 %v683_v35, 0.0 }
 0x125   :  { %v716_v39 = vmax.f32 %v684_v37, 0.0  ;;  %v1410_v40 = vpop.f32.mrb[24].mxu0 }
 0x126   :  { %v1411_v41 = vpop.f32.mrb[25].mxu0 }
 0x127   :  { %v1412_v42 = vadd.f32 %v1411_v41, %v1410_v40  ;;  %v1413_v43 = vpop.f32.mrb[26].mxu0  ;;  %v742_v44 = vpack.c.bf16 %v716_v39, %v715_v38 }
 0x128   :  { %v1414_v46 = vpop.f32.mrb[27].mxu0 }
 0x129   :  { %v685_v47 = vadd.f32 %v1412_v42, %v1826_v58  ;;  %v1415_v48 = vadd.f32 %v1414_v46, %v1413_v43  ;;  %1519 = vmatmul.mubr.bf16.gmra.mrb[24].mxu1 %v742_v44 }
 0x12b   :  { %v686_v49 = vadd.f32 %v1415_v48, %v1826_v58  ;;  %v717_v50 = vmax.f32 %v685_v47, 0.0 }
 0x12d   :  { %v718_v51 = vmax.f32 %v686_v49, 0.0  ;;  %v1416_v52 = vpop.f32.mrb[28].mxu0 }
 0x12e   :  { %v1417_v53 = vpop.f32.mrb[29].mxu0 }
 0x12f   :  { %v1418_v54 = vadd.f32 %v1417_v53, %v1416_v52  ;;  %v1419_v55 = vpop.f32.mrb[30].mxu0  ;;  %v743_v56 = vpack.c.bf16 %v718_v51, %v717_v50 }
 0x130   :  { %v1420_v57 = vpop.f32.mrb[31].mxu0 }
 0x131   :  { %v687_v59 = vadd.f32 %v1418_v54, %v1826_v58  ;;  %v1421_v60 = vadd.f32 %v1420_v57, %v1419_v55  ;;  %1522 = vmatprep.mubr.bf16.mxu1 %v743_v56 }
 0x133   :  { %v688_v61 = vadd.f32 %v1421_v60, %v1826_v58  ;;  %v719_v62 = vmax.f32 %v687_v59, 0.0 }
 0x135   :  { %v720_v63 = vmax.f32 %v688_v61, 0.0  ;;  %v1422_v0 = vpop.f32.mrb[32].mxu0 }
 0x136   :  { %v1423_v1 = vpop.f32.mrb[33].mxu0 }
 0x137   :  { %v1424_v2 = vadd.f32 %v1423_v1, %v1422_v0  ;;  %v1425_v3 = vpop.f32.mrb[34].mxu0  ;;  %v744_v5 = vpack.c.bf16 %v720_v63, %v719_v62 }
 0x138   :  { %v1426_v6 = vpop.f32.mrb[35].mxu0 }
 0x139   :  { %v689_v7 = vadd.f32 %v1424_v2, %v1826_v58  ;;  %v1427_v8 = vadd.f32 %v1426_v6, %v1425_v3  ;;  %1523 = vmatmul.mubr.bf16.gmra.mrb[28].mxu1 %v744_v5 }
 0x13b   :  { %v690_v9 = vadd.f32 %v1427_v8, %v1826_v58  ;;  %v721_v10 = vmax.f32 %v689_v7, 0.0 }
 0x13d   :  { %v722_v11 = vmax.f32 %v690_v9, 0.0  ;;  %v1428_v12 = vpop.f32.mrb[36].mxu0 }
 0x13e   :  { %v1429_v13 = vpop.f32.mrb[37].mxu0 }
 0x13f   :  { %v1430_v14 = vadd.f32 %v1429_v13, %v1428_v12  ;;  %v1431_v15 = vpop.f32.mrb[38].mxu0  ;;  %v745_v16 = vpack.c.bf16 %v722_v11, %v721_v10 }
 0x140   :  { %v1432_v17 = vpop.f32.mrb[39].mxu0 }
 0x141   :  { %v691_v18 = vadd.f32 %v1430_v14, %v1826_v58  ;;  %v1433_v19 = vadd.f32 %v1432_v17, %v1431_v15  ;;  %1526 = vmatprep.mubr.bf16.mxu1 %v745_v16 }
 0x143   :  { %v692_v20 = vadd.f32 %v1433_v19, %v1826_v58  ;;  %v723_v21 = vmax.f32 %v691_v18, 0.0 }
 0x145   :  { %v724_v24 = vmax.f32 %v692_v20, 0.0  ;;  %v1434_v25 = vpop.f32.mrb[40].mxu0 }
 0x146   :  { %v1435_v26 = vpop.f32.mrb[41].mxu0 }
 0x147   :  { %v1436_v27 = vadd.f32 %v1435_v26, %v1434_v25  ;;  %v1437_v28 = vpop.f32.mrb[42].mxu0  ;;  %v746_v29 = vpack.c.bf16 %v724_v24, %v723_v21 }
 0x148   :  { %v1438_v30 = vpop.f32.mrb[43].mxu0 }
 0x149   :  { %v693_v31 = vadd.f32 %v1436_v27, %v1826_v58  ;;  %v1439_v32 = vadd.f32 %v1438_v30, %v1437_v28  ;;  %1527 = vmatmul.mubr.bf16.gmra.mrb[32].mxu1 %v746_v29 }
 0x14b   :  { %v694_v33 = vadd.f32 %v1439_v32, %v1826_v58  ;;  %v725_v34 = vmax.f32 %v693_v31, 0.0 }
 0x14d   :  { %v726_v35 = vmax.f32 %v694_v33, 0.0  ;;  %v1440_v36 = vpop.f32.mrb[44].mxu0 }
 0x14e   :  { %v1441_v37 = vpop.f32.mrb[45].mxu0 }
 0x14f   :  { %v1442_v38 = vadd.f32 %v1441_v37, %v1440_v36  ;;  %v1443_v39 = vpop.f32.mrb[46].mxu0  ;;  %v747_v40 = vpack.c.bf16 %v726_v35, %v725_v34 }
 0x150   :  { %v1444_v41 = vpop.f32.mrb[47].mxu0 }
 0x151   :  { %v695_v42 = vadd.f32 %v1442_v38, %v1826_v58  ;;  %v1445_v43 = vadd.f32 %v1444_v41, %v1443_v39  ;;  %1530 = vmatprep.mubr.bf16.mxu1 %v747_v40 }
 0x153   :  { %v696_v44 = vadd.f32 %v1445_v43, %v1826_v58  ;;  %v727_v46 = vmax.f32 %v695_v42, 0.0 }
 0x155   :  { %v728_v47 = vmax.f32 %v696_v44, 0.0 }
 0x157   :  { %v748_v48 = vpack.c.bf16 %v728_v47, %v727_v46 }
 0x159   :  { %1531 = vmatmul.mubr.bf16.gmra.mrb[36].mxu1 %v748_v48 }
 0x15a   :  { %1534 = vmatprep.mubr.bf16.mxu1 %v1832_v23 }
 0x161   :  { %1535 = vmatmul.mubr.bf16.gmra.mrb[40].mxu1 %v1838_v45 }
 0x162   :  { %1538 = vmatprep.mubr.bf16.mxu1 %v1844_v4 }
 0x169   :  { %1539 = vmatmul.mubr.bf16.gmra.mrb[44].mxu1 %v1850_v22 }
 0x1dc   :  { %v1512_v49 = vpop.f32.mrb[16].mxu1 }
 0x1dd   :  { %v851_v50 = vpop.f32.mrb[17].mxu1 }
 0x1de   :  { %v1513_v51 = vpop.f32.mrb[18].mxu1 }
 0x1df   :  { %v1271_v52 = vpack.c.bf16 %v1513_v51, %v1512_v49  ;;  %v854_v53 = vpop.f32.mrb[19].mxu1 }
 0x1e0   :  { %v1266_v54 = vpack.c.bf16 %v854_v53, %v851_v50 }
 0x1e1   :  { %1343 = vst [vmem:[%s1924_s4 + $0x8] sm:$0xff] %v1271_v52  }
 0x1e2   :  { %1267 = vst [vmem:[%s1924_s4] sm:$0xff] %v1266_v54  }
 0x1ec   :  { %v1516_v58 = vpop.f32.mrb[20].mxu1 }
 0x1ed   :  { %v867_v23 = vpop.f32.mrb[21].mxu1 }
 0x1ee   :  { %v1517_v45 = vpop.f32.mrb[22].mxu1 }
 0x1ef   :  { %v1281_v4 = vpack.c.bf16 %v1517_v45, %v1516_v58  ;;  %v870_v55 = vpop.f32.mrb[23].mxu1 }
 0x1f0   :  { %v1276_v22 = vpack.c.bf16 %v870_v55, %v867_v23 }
 0x1f1   :  { %1345 = vst [vmem:[%s1924_s4 + $0x18] sm:$0xff] %v1281_v4  }
 0x1f2   :  { %1344 = vst [vmem:[%s1924_s4 + $0x10] sm:$0xff] %v1276_v22  }
 0x1fc   :  { %v1520_v56 = vpop.f32.mrb[24].mxu1 }
 0x1fd   :  { %v883_v57 = vpop.f32.mrb[25].mxu1 }
 0x1fe   :  { %v1521_v59 = vpop.f32.mrb[26].mxu1 }
 0x1ff   :  { %v1291_v60 = vpack.c.bf16 %v1521_v59, %v1520_v56  ;;  %v886_v61 = vpop.f32.mrb[27].mxu1 }
 0x200   :  { %v1286_v62 = vpack.c.bf16 %v886_v61, %v883_v57 }
 0x201   :  { %1347 = vst [vmem:[%s1924_s4 + $0x28] sm:$0xff] %v1291_v60  }
 0x202   :  { %1346 = vst [vmem:[%s1924_s4 + $0x20] sm:$0xff] %v1286_v62  }
 0x20c   :  { %v1524_v63 = vpop.f32.mrb[28].mxu1 }
 0x20d   :  { %v899_v0 = vpop.f32.mrb[29].mxu1 }
 0x20e   :  { %v1525_v1 = vpop.f32.mrb[30].mxu1 }
 0x20f   :  { %v1301_v2 = vpack.c.bf16 %v1525_v1, %v1524_v63  ;;  %v902_v3 = vpop.f32.mrb[31].mxu1 }
 0x210   :  { %v1296_v5 = vpack.c.bf16 %v902_v3, %v899_v0 }
 0x211   :  { %1349 = vst [vmem:[%s1924_s4 + $0x38] sm:$0xff] %v1301_v2  }
 0x212   :  { %1348 = vst [vmem:[%s1924_s4 + $0x30] sm:$0xff] %v1296_v5  }
 0x21c   :  { %v1528_v6 = vpop.f32.mrb[32].mxu1 }
 0x21d   :  { %v915_v7 = vpop.f32.mrb[33].mxu1 }
 0x21e   :  { %v1529_v8 = vpop.f32.mrb[34].mxu1 }
 0x21f   :  { %v1311_v9 = vpack.c.bf16 %v1529_v8, %v1528_v6  ;;  %v918_v10 = vpop.f32.mrb[35].mxu1 }
 0x220   :  { %v1306_v11 = vpack.c.bf16 %v918_v10, %v915_v7 }
 0x221   :  { %1351 = vst [vmem:[%s1924_s4 + $0x48] sm:$0xff] %v1311_v9  }
 0x222   :  { %1350 = vst [vmem:[%s1924_s4 + $0x40] sm:$0xff] %v1306_v11  }
 0x22c   :  { %v1532_v12 = vpop.f32.mrb[36].mxu1 }
 0x22d   :  { %v931_v13 = vpop.f32.mrb[37].mxu1 }
 0x22e   :  { %v1533_v14 = vpop.f32.mrb[38].mxu1 }
 0x22f   :  { %v1321_v15 = vpack.c.bf16 %v1533_v14, %v1532_v12  ;;  %v934_v16 = vpop.f32.mrb[39].mxu1 }
 0x230   :  { %v1316_v17 = vpack.c.bf16 %v934_v16, %v931_v13 }
 0x231   :  { %1353 = vst [vmem:[%s1924_s4 + $0x58] sm:$0xff] %v1321_v15  }
 0x232   :  { %1352 = vst [vmem:[%s1924_s4 + $0x50] sm:$0xff] %v1316_v17  }
 0x234   :  { %v1536_v18 = vpop.f32.mrb[40].mxu1 }
 0x235   :  { %v947_v19 = vpop.f32.mrb[41].mxu1 }
 0x236   :  { %v1537_v20 = vpop.f32.mrb[42].mxu1 }
 0x237   :  { %v1331_v21 = vpack.c.bf16 %v1537_v20, %v1536_v18  ;;  %v950_v24 = vpop.f32.mrb[43].mxu1 }
 0x238   :  { %v1326_v25 = vpack.c.bf16 %v950_v24, %v947_v19 }
 0x239   :  { %1355 = vst [vmem:[%s1924_s4 + $0x68] sm:$0xff] %v1331_v21  }
 0x23a   :  { %1354 = vst [vmem:[%s1924_s4 + $0x60] sm:$0xff] %v1326_v25  }
 0x23c   :  { %v1540_v26 = vpop.f32.mrb[44].mxu1 }
 0x23d   :  { %v963_v27 = vpop.f32.mrb[45].mxu1 }
 0x23e   :  { %v1541_v28 = vpop.f32.mrb[46].mxu1 }
 0x23f   :  { %v1341_v29 = vpack.c.bf16 %v1541_v28, %v1540_v26  ;;  %v966_v30 = vpop.f32.mrb[47].mxu1 }
 0x240   :  { %v1336_v31 = vpack.c.bf16 %v966_v30, %v963_v27 }
 0x241   :  { %1357 = vst [vmem:[%s1924_s4 + $0x78] sm:$0xff] %v1341_v29  }
 0x242   :  { %1356 = vst [vmem:[%s1924_s4 + $0x70] sm:$0xff] %v1336_v31  }

</bundles_post_ra>
